<compile_context>
chip_gen: v5e
topology: v5e:2x2
jax: 0.10.0
libtpu: 0.0.40
codegen_flags: <defaults>
</compile_context>

<pallas_src>
import jax
import jax.numpy as jnp
from jax import lax
from jax.experimental import pallas as pl
from jax.experimental.pallas import tpu as pltpu

HIDDEN = 128          # hidden_dim default of the PyTorch module
Z_DIM = 128           # prototype feature dim
A_DIM = 3             # action dim
K_PAD = 256           # fused input-projection depth: [0:128]=z, [128:131]=a, rest zero
HEAD_W = 256          # fused head width: [0:64] policy hidden, [128:256] transition hidden


# ----------------------------------------------------------------------------
# Kernel
# ----------------------------------------------------------------------------
def _lstm_heads_kernel(x_ref, wx_ref, b_ref, whh_ref,
                       w1_ref, b1_ref, w2_ref, b2_ref,
                       out_ref, gx_ref):
    Bp = out_ref.shape[0]
    H = whh_ref.shape[0]
    T = x_ref.shape[0] // Bp

    # ---- Input projection for every time step at once, into VMEM scratch ----
    #   (T*Bp, 256) @ (256, 4H) + bias, bf16 MXU inputs, f32 accumulation.
    gx_ref[...] = (
        jnp.dot(x_ref[...], wx_ref[...], preferred_element_type=jnp.float32)
        + b_ref[...])

    # Single-EUP-pass sigmoid (== jax.nn.sigmoid mathematically).
    def sig(v):
        return 0.5 * jnp.tanh(0.5 * v) + 0.5

    # ---- LSTM recurrence, fully unrolled (T is static, small) ----
    h = jnp.zeros((Bp, H), jnp.float32)
    c = jnp.zeros((Bp, H), jnp.float32)
    for t in range(T):
        gx = gx_ref[t * Bp:(t + 1) * Bp, :]                 # static, 8-aligned slice
        gates = gx + jnp.dot(h.astype(jnp.bfloat16), whh_ref[...],
                             preferred_element_type=jnp.float32)
        i = sig(gates[:, 0 * H:1 * H])
        f = sig(gates[:, 1 * H:2 * H])
        g = jnp.tanh(gates[:, 2 * H:3 * H])
        o = sig(gates[:, 3 * H:4 * H])
        c = f * c + i * g
        h = o * jnp.tanh(c)

    # ---- Fused heads: Linear -> ReLU -> Linear, one lane-dense output slab ----
    h1 = jnp.maximum(
        jnp.dot(h.astype(jnp.bfloat16), w1_ref[...],
                preferred_element_type=jnp.float32) + b1_ref[...], 0.0)
    out_ref[...] = (jnp.dot(h1.astype(jnp.bfloat16), w2_ref[...],
                            preferred_element_type=jnp.float32) + b2_ref[...])


# ----------------------------------------------------------------------------
# Parameters
# ----------------------------------------------------------------------------
def init_params(key, hidden_dim=HIDDEN):
    """Deterministic parameter init mimicking PyTorch's uniform(-1/sqrt(fan), ...)."""
    ks = jax.random.split(key, 12)
    klstm = 1.0 / jnp.sqrt(hidden_dim)

    def u(k, shape, bound):
        return jax.random.uniform(k, shape, jnp.float32, -bound, bound)

    return dict(
        # LSTM (PyTorch gate order: i, f, g, o)
        w_ih=u(ks[0], (4 * hidden_dim, Z_DIM + A_DIM), klstm),
        w_hh=u(ks[1], (4 * hidden_dim, hidden_dim), klstm),
        b_ih=u(ks[2], (4 * hidden_dim,), klstm),
        b_hh=u(ks[3], (4 * hidden_dim,), klstm),
        # policy head
        p_w1=u(ks[4], (64, hidden_dim), 1.0 / jnp.sqrt(hidden_dim)),
        p_b1=u(ks[5], (64,), 1.0 / jnp.sqrt(hidden_dim)),
        p_w2=u(ks[6], (3, 64), 1.0 / jnp.sqrt(64.0)),
        p_b2=u(ks[7], (3,), 1.0 / jnp.sqrt(64.0)),
        # transition head
        t_w1=u(ks[8], (128, hidden_dim), 1.0 / jnp.sqrt(hidden_dim)),
        t_b1=u(ks[9], (128,), 1.0 / jnp.sqrt(hidden_dim)),
        t_w2=u(ks[10], (128, 128), 1.0 / jnp.sqrt(128.0)),
        t_b2=u(ks[11], (128,), 1.0 / jnp.sqrt(128.0)),
    )


def pack_params(params, hidden_dim=HIDDEN):
    """One-time weight packing (called OUTSIDE the per-call forward path).

    Produces the exact kernel-ready slabs so the jitted forward contains no
    weight-prep HLOs.
    """
    H = hidden_dim

    # Fused input projection weight: (K_PAD, 4H); rows 0:131 = w_ih.T, rest zero.
    wx = jnp.zeros((K_PAD, 4 * H), jnp.float32)
    wx = wx.at[:Z_DIM + A_DIM, :].set(params["w_ih"].T)
    wx = wx.astype(jnp.bfloat16)
    b = (params["b_ih"] + params["b_hh"]).reshape(1, 4 * H).astype(jnp.float32)

    whh = params["w_hh"].T.astype(jnp.bfloat16)                               # (H, 4H)

    # Fused head layer 1: (H, 256); cols 0:64 = policy, 128:256 = transition.
    w1 = jnp.zeros((H, HEAD_W), jnp.float32)
    w1 = w1.at[:, 0:64].set(params["p_w1"].T)
    w1 = w1.at[:, 128:256].set(params["t_w1"].T)
    w1 = w1.astype(jnp.bfloat16)
    b1 = jnp.zeros((1, HEAD_W), jnp.float32)
    b1 = b1.at[0, 0:64].set(params["p_b1"])
    b1 = b1.at[0, 128:256].set(params["t_b1"])

    # Fused head layer 2: block-diagonal (256, 256).
    w2 = jnp.zeros((HEAD_W, HEAD_W), jnp.float32)
    w2 = w2.at[0:64, 0:3].set(params["p_w2"].T)
    w2 = w2.at[128:256, 128:256].set(params["t_w2"].T)
    w2 = w2.astype(jnp.bfloat16)
    b2 = jnp.zeros((1, HEAD_W), jnp.float32)
    b2 = b2.at[0, 0:3].set(params["p_b2"])
    b2 = b2.at[0, 128:256].set(params["t_b2"])

    return dict(wx=wx, b=b, whh=whh, w1=w1, b1=b1, w2=w2, b2=b2)


# ----------------------------------------------------------------------------
# Forward
# ----------------------------------------------------------------------------
@jax.jit
def prototype_to_action_forward(z_seq, a_seq, packed):
    B, T, Dz = z_seq.shape
    Da = a_seq.shape[-1]
    H = HIDDEN
    Bp = max(8, ((B + 7) // 8) * 8)         # batch padded to the sublane granule

    # ---- minimal per-call glue: concat -> time-major -> pad -> flatten -> bf16 ----
    x = jnp.concatenate([z_seq, a_seq], axis=-1)                   # (B, T, 131)
    x = jnp.transpose(x, (1, 0, 2))                                # (T, B, 131)
    x = jnp.pad(x, ((0, 0), (0, Bp - B), (0, K_PAD - (Dz + Da))))  # (T, Bp, 256)
    x = x.reshape(T * Bp, K_PAD).astype(jnp.bfloat16)

    flops = (2 * T * Bp * K_PAD * 4 * H          # input projection
             + 2 * T * Bp * H * 4 * H            # recurrent matmuls
             + 2 * Bp * H * HEAD_W               # head layer 1
             + 2 * Bp * HEAD_W * HEAD_W)         # head layer 2
    bytes_accessed = (T * Bp * K_PAD * 2
                      + (K_PAD * 4 * H + H * 4 * H + H * HEAD_W + HEAD_W * HEAD_W) * 2
                      + (4 * H + 2 * HEAD_W) * 4
                      + Bp * HEAD_W * 4)
    cost = pl.CostEstimate(flops=flops,
                           transcendentals=T * Bp * 5 * H,
                           bytes_accessed=bytes_accessed)

    vmem = pl.BlockSpec(memory_space=pltpu.MemorySpace.VMEM)
    out = pl.pallas_call(
        _lstm_heads_kernel,
        out_shape=jax.ShapeDtypeStruct((Bp, HEAD_W), jnp.float32),
        in_specs=[vmem] * 8,
        out_specs=vmem,
        scratch_shapes=[pltpu.VMEM((T * Bp, 4 * H), jnp.float32)],
        compiler_params=pltpu.CompilerParams(vmem_limit_bytes=32 * 1024 * 1024),
        cost_estimate=cost,
    )(x, packed["wx"], packed["b"], packed["whh"],
      packed["w1"], packed["b1"], packed["w2"], packed["b2"])

    policy = out[:B, :3]
    transition = out[:B, 128:256]
    return policy, transition


# ----------------------------------------------------------------------------
# Pure-JAX reference (PyTorch LSTM + heads semantics) for verification
# ----------------------------------------------------------------------------
def _reference_forward(z_seq, a_seq, params, mm_dtype=jnp.float32):
    """mm_dtype=bf16 mirrors the kernel's MXU-input rounding; f32 = exact PyTorch.
    Accumulation, carries and nonlinearities are always f32."""
    H = HIDDEN
    x = jnp.concatenate([z_seq, a_seq], axis=-1)            # (B, T, 131)
    B = x.shape[0]

    wih = params["w_ih"].astype(mm_dtype)
    whh = params["w_hh"].astype(mm_dtype)
    pw1 = params["p_w1"].astype(mm_dtype)
    pw2 = params["p_w2"].astype(mm_dtype)
    tw1 = params["t_w1"].astype(mm_dtype)
    tw2 = params["t_w2"].astype(mm_dtype)

    def mm(a_, b_):
        return jnp.dot(a_.astype(mm_dtype), b_, preferred_element_type=jnp.float32)

    def step(carry, x_t):
        h, c = carry
        gates = (mm(x_t, wih.T) + params["b_ih"] + params["b_hh"] + mm(h, whh.T))
        i = jax.nn.sigmoid(gates[:, 0 * H:1 * H])
        f = jax.nn.sigmoid(gates[:, 1 * H:2 * H])
        g = jnp.tanh(gates[:, 2 * H:3 * H])
        o = jax.nn.sigmoid(gates[:, 3 * H:4 * H])
        c = f * c + i * g
        h = o * jnp.tanh(c)
        return (h, c), None

    h0 = jnp.zeros((B, H), jnp.float32)
    c0 = jnp.zeros((B, H), jnp.float32)
    (h, _), _ = lax.scan(step, (h0, c0), jnp.transpose(x, (1, 0, 2)))

    p = jnp.maximum(mm(h, pw1.T) + params["p_b1"], 0.0)
    policy = mm(p, pw2.T) + params["p_b2"]
    t = jnp.maximum(mm(h, tw1.T) + params["t_b1"], 0.0)
    trans = mm(t, tw2.T) + params["t_b2"]
    return policy, trans


if __name__ == "__main__":
    key = jax.random.PRNGKey(0)
    k_z, k_a, k_p = jax.random.split(key, 3)

    B, T = 2, 8
    z_seq = jax.random.normal(k_z, (B, T, Z_DIM), jnp.float32)
    a_seq = jax.random.normal(k_a, (B, T, A_DIM), jnp.float32)
    params = init_params(k_p)

    # One-time weight packing (off the per-call path).
    packed = pack_params(params)

    policy, transition = prototype_to_action_forward(z_seq, a_seq, packed)
    policy = jax.block_until_ready(policy)
    transition = jax.block_until_ready(transition)

    assert policy.shape == (B, 3) and transition.shape == (B, 128)

    # Tight check vs a reference with the same bf16 MXU-input rounding.
    rp, rt = _reference_forward(z_seq, a_seq, params, mm_dtype=jnp.bfloat16)
    assert jnp.allclose(policy, rp, atol=2e-3, rtol=2e-3)
    assert jnp.allclose(transition, rt, atol=2e-3, rtol=2e-3)

    # Loose sanity check vs the exact f32 PyTorch semantics (bf16 MXU inputs are
    # a deliberate performance trade-off; accumulation/carries remain f32).
    fp, ft = _reference_forward(z_seq, a_seq, params, mm_dtype=jnp.float32)
    assert jnp.allclose(policy, fp, atol=1e-1, rtol=1e-1)
    assert jnp.allclose(transition, ft, atol=1e-1, rtol=1e-1)

    print("KERNEL_OK")
</pallas_src>

<mosaic_0001>
module attributes {stable_mosaic.version = 11 : i64} {
  func.func @_lstm_heads_kernel(%arg0: memref<64x256xbf16, #tpu.memory_space<vmem>>, %arg1: memref<256x512xbf16, #tpu.memory_space<vmem>>, %arg2: memref<1x512xf32, #tpu.memory_space<vmem>>, %arg3: memref<128x512xbf16, #tpu.memory_space<vmem>>, %arg4: memref<128x256xbf16, #tpu.memory_space<vmem>>, %arg5: memref<1x256xf32, #tpu.memory_space<vmem>>, %arg6: memref<256x256xbf16, #tpu.memory_space<vmem>>, %arg7: memref<1x256xf32, #tpu.memory_space<vmem>>, %arg8: memref<8x256xf32, #tpu.memory_space<vmem>>, %arg9: memref<64x512xf32, #tpu.memory_space<vmem>>) attributes {dimension_semantics = [], scalar_prefetch = 0 : i64, scratch_operands = 1 : i64, tpu.core_type = #tpu.core_type<tc>} {
    %c0 = arith.constant 0 : index
    %c0_0 = arith.constant 0 : index
    %0 = vector.load %arg0[%c0, %c0_0] : memref<64x256xbf16, #tpu.memory_space<vmem>>, vector<64x256xbf16>
    %c0_1 = arith.constant 0 : index
    %c0_2 = arith.constant 0 : index
    %1 = vector.load %arg1[%c0_1, %c0_2] : memref<256x512xbf16, #tpu.memory_space<vmem>>, vector<256x512xbf16>
    %cst = arith.constant dense<0.000000e+00> : vector<64x512xf32>
    %2 = tpu.matmul %0, %1, %cst {dimension_numbers = #tpu.dot_dimension_numbers<[1], [0], [0], [1], [0, 0, 1, 1], [], []>} : vector<64x256xbf16>, vector<256x512xbf16>, vector<64x512xf32> -> vector<64x512xf32>
    %c0_3 = arith.constant 0 : index
    %c0_4 = arith.constant 0 : index
    %3 = vector.load %arg2[%c0_3, %c0_4] : memref<1x512xf32, #tpu.memory_space<vmem>>, vector<1x512xf32>
    %4 = vector.broadcast %3 : vector<1x512xf32> to vector<64x512xf32>
    %5 = arith.addf %2, %4 : vector<64x512xf32>
    %c0_5 = arith.constant 0 : index
    %c0_6 = arith.constant 0 : index
    %6 = vector.load %arg9[%c0_5, %c0_6] : memref<64x512xf32, #tpu.memory_space<vmem>>, vector<64x512xf32>
    tpu.vector_store %arg9[%c0_5, %c0_6], %5 {strides = array<i32>} : memref<64x512xf32, #tpu.memory_space<vmem>>, vector<64x512xf32>,
    %cst_7 = arith.constant 0.000000e+00 : f32
    %7 = vector.broadcast %cst_7 : f32 to vector<8x128xf32>
    %cst_8 = arith.constant 0.000000e+00 : f32
    %8 = vector.broadcast %cst_8 : f32 to vector<8x128xf32>
    %c0_9 = arith.constant 0 : index
    %c0_10 = arith.constant 0 : index
    %9 = vector.load %arg9[%c0_9, %c0_10] : memref<64x512xf32, #tpu.memory_space<vmem>>, vector<8x512xf32>
    %10 = arith.truncf %7 : vector<8x128xf32> to vector<8x128xbf16>
    %c0_11 = arith.constant 0 : index
    %c0_12 = arith.constant 0 : index
    %11 = vector.load %arg3[%c0_11, %c0_12] : memref<128x512xbf16, #tpu.memory_space<vmem>>, vector<128x512xbf16>
    %cst_13 = arith.constant dense<0.000000e+00> : vector<8x512xf32>
    %12 = tpu.matmul %10, %11, %cst_13 {dimension_numbers = #tpu.dot_dimension_numbers<[1], [0], [0], [1], [0, 0, 1, 1], [], []>} : vector<8x128xbf16>, vector<128x512xbf16>, vector<8x512xf32> -> vector<8x512xf32>
    %13 = arith.addf %9, %12 : vector<8x512xf32>
    %14 = vector.extract_strided_slice %13 {offsets = [0, 0], sizes = [8, 128], strides = [1, 1]} : vector<8x512xf32> to vector<8x128xf32>
    %cst_14 = arith.constant 5.000000e-01 : f32
    %15 = vector.broadcast %cst_14 : f32 to vector<8x128xf32>
    %16 = arith.mulf %15, %14 : vector<8x128xf32>
    %17 = math.tanh %16 : vector<8x128xf32>
    %cst_15 = arith.constant 5.000000e-01 : f32
    %18 = vector.broadcast %cst_15 : f32 to vector<8x128xf32>
    %19 = arith.mulf %18, %17 : vector<8x128xf32>
    %cst_16 = arith.constant 5.000000e-01 : f32
    %20 = vector.broadcast %cst_16 : f32 to vector<8x128xf32>
    %21 = arith.addf %19, %20 : vector<8x128xf32>
    %22 = vector.extract_strided_slice %13 {offsets = [0, 128], sizes = [8, 128], strides = [1, 1]} : vector<8x512xf32> to vector<8x128xf32>
    %cst_17 = arith.constant 5.000000e-01 : f32
    %23 = vector.broadcast %cst_17 : f32 to vector<8x128xf32>
    %24 = arith.mulf %23, %22 : vector<8x128xf32>
    %25 = math.tanh %24 : vector<8x128xf32>
    %cst_18 = arith.constant 5.000000e-01 : f32
    %26 = vector.broadcast %cst_18 : f32 to vector<8x128xf32>
    %27 = arith.mulf %26, %25 : vector<8x128xf32>
    %cst_19 = arith.constant 5.000000e-01 : f32
    %28 = vector.broadcast %cst_19 : f32 to vector<8x128xf32>
    %29 = arith.addf %27, %28 : vector<8x128xf32>
    %30 = vector.extract_strided_slice %13 {offsets = [0, 256], sizes = [8, 128], strides = [1, 1]} : vector<8x512xf32> to vector<8x128xf32>
    %31 = math.tanh %30 : vector<8x128xf32>
    %32 = vector.extract_strided_slice %13 {offsets = [0, 384], sizes = [8, 128], strides = [1, 1]} : vector<8x512xf32> to vector<8x128xf32>
    %cst_20 = arith.constant 5.000000e-01 : f32
    %33 = vector.broadcast %cst_20 : f32 to vector<8x128xf32>
    %34 = arith.mulf %33, %32 : vector<8x128xf32>
    %35 = math.tanh %34 : vector<8x128xf32>
    %cst_21 = arith.constant 5.000000e-01 : f32
    %36 = vector.broadcast %cst_21 : f32 to vector<8x128xf32>
    %37 = arith.mulf %36, %35 : vector<8x128xf32>
    %cst_22 = arith.constant 5.000000e-01 : f32
    %38 = vector.broadcast %cst_22 : f32 to vector<8x128xf32>
    %39 = arith.addf %37, %38 : vector<8x128xf32>
    %40 = arith.mulf %29, %8 : vector<8x128xf32>
    %41 = arith.mulf %21, %31 : vector<8x128xf32>
    %42 = arith.addf %40, %41 : vector<8x128xf32>
    %43 = math.tanh %42 : vector<8x128xf32>
    %44 = arith.mulf %39, %43 : vector<8x128xf32>
    %c8 = arith.constant 8 : index
    %c0_23 = arith.constant 0 : index
    %45 = vector.load %arg9[%c8, %c0_23] : memref<64x512xf32, #tpu.memory_space<vmem>>, vector<8x512xf32>
    %46 = arith.truncf %44 : vector<8x128xf32> to vector<8x128xbf16>
    %c0_24 = arith.constant 0 : index
    %c0_25 = arith.constant 0 : index
    %47 = vector.load %arg3[%c0_24, %c0_25] : memref<128x512xbf16, #tpu.memory_space<vmem>>, vector<128x512xbf16>
    %cst_26 = arith.constant dense<0.000000e+00> : vector<8x512xf32>
    %48 = tpu.matmul %46, %47, %cst_26 {dimension_numbers = #tpu.dot_dimension_numbers<[1], [0], [0], [1], [0, 0, 1, 1], [], []>} : vector<8x128xbf16>, vector<128x512xbf16>, vector<8x512xf32> -> vector<8x512xf32>
    %49 = arith.addf %45, %48 : vector<8x512xf32>
    %50 = vector.extract_strided_slice %49 {offsets = [0, 0], sizes = [8, 128], strides = [1, 1]} : vector<8x512xf32> to vector<8x128xf32>
    %cst_27 = arith.constant 5.000000e-01 : f32
    %51 = vector.broadcast %cst_27 : f32 to vector<8x128xf32>
    %52 = arith.mulf %51, %50 : vector<8x128xf32>
    %53 = math.tanh %52 : vector<8x128xf32>
    %cst_28 = arith.constant 5.000000e-01 : f32
    %54 = vector.broadcast %cst_28 : f32 to vector<8x128xf32>
    %55 = arith.mulf %54, %53 : vector<8x128xf32>
    %cst_29 = arith.constant 5.000000e-01 : f32
    %56 = vector.broadcast %cst_29 : f32 to vector<8x128xf32>
    %57 = arith.addf %55, %56 : vector<8x128xf32>
    %58 = vector.extract_strided_slice %49 {offsets = [0, 128], sizes = [8, 128], strides = [1, 1]} : vector<8x512xf32> to vector<8x128xf32>
    %cst_30 = arith.constant 5.000000e-01 : f32
    %59 = vector.broadcast %cst_30 : f32 to vector<8x128xf32>
    %60 = arith.mulf %59, %58 : vector<8x128xf32>
    %61 = math.tanh %60 : vector<8x128xf32>
    %cst_31 = arith.constant 5.000000e-01 : f32
    %62 = vector.broadcast %cst_31 : f32 to vector<8x128xf32>
    %63 = arith.mulf %62, %61 : vector<8x128xf32>
    %cst_32 = arith.constant 5.000000e-01 : f32
    %64 = vector.broadcast %cst_32 : f32 to vector<8x128xf32>
    %65 = arith.addf %63, %64 : vector<8x128xf32>
    %66 = vector.extract_strided_slice %49 {offsets = [0, 256], sizes = [8, 128], strides = [1, 1]} : vector<8x512xf32> to vector<8x128xf32>
    %67 = math.tanh %66 : vector<8x128xf32>
    %68 = vector.extract_strided_slice %49 {offsets = [0, 384], sizes = [8, 128], strides = [1, 1]} : vector<8x512xf32> to vector<8x128xf32>
    %cst_33 = arith.constant 5.000000e-01 : f32
    %69 = vector.broadcast %cst_33 : f32 to vector<8x128xf32>
    %70 = arith.mulf %69, %68 : vector<8x128xf32>
    %71 = math.tanh %70 : vector<8x128xf32>
    %cst_34 = arith.constant 5.000000e-01 : f32
    %72 = vector.broadcast %cst_34 : f32 to vector<8x128xf32>
    %73 = arith.mulf %72, %71 : vector<8x128xf32>
    %cst_35 = arith.constant 5.000000e-01 : f32
    %74 = vector.broadcast %cst_35 : f32 to vector<8x128xf32>
    %75 = arith.addf %73, %74 : vector<8x128xf32>
    %76 = arith.mulf %65, %42 : vector<8x128xf32>
    %77 = arith.mulf %57, %67 : vector<8x128xf32>
    %78 = arith.addf %76, %77 : vector<8x128xf32>
    %79 = math.tanh %78 : vector<8x128xf32>
    %80 = arith.mulf %75, %79 : vector<8x128xf32>
    %c16 = arith.constant 16 : index
    %c0_36 = arith.constant 0 : index
    %81 = vector.load %arg9[%c16, %c0_36] : memref<64x512xf32, #tpu.memory_space<vmem>>, vector<8x512xf32>
    %82 = arith.truncf %80 : vector<8x128xf32> to vector<8x128xbf16>
    %c0_37 = arith.constant 0 : index
    %c0_38 = arith.constant 0 : index
    %83 = vector.load %arg3[%c0_37, %c0_38] : memref<128x512xbf16, #tpu.memory_space<vmem>>, vector<128x512xbf16>
    %cst_39 = arith.constant dense<0.000000e+00> : vector<8x512xf32>
    %84 = tpu.matmul %82, %83, %cst_39 {dimension_numbers = #tpu.dot_dimension_numbers<[1], [0], [0], [1], [0, 0, 1, 1], [], []>} : vector<8x128xbf16>, vector<128x512xbf16>, vector<8x512xf32> -> vector<8x512xf32>
    %85 = arith.addf %81, %84 : vector<8x512xf32>
    %86 = vector.extract_strided_slice %85 {offsets = [0, 0], sizes = [8, 128], strides = [1, 1]} : vector<8x512xf32> to vector<8x128xf32>
    %cst_40 = arith.constant 5.000000e-01 : f32
    %87 = vector.broadcast %cst_40 : f32 to vector<8x128xf32>
    %88 = arith.mulf %87, %86 : vector<8x128xf32>
    %89 = math.tanh %88 : vector<8x128xf32>
    %cst_41 = arith.constant 5.000000e-01 : f32
    %90 = vector.broadcast %cst_41 : f32 to vector<8x128xf32>
    %91 = arith.mulf %90, %89 : vector<8x128xf32>
    %cst_42 = arith.constant 5.000000e-01 : f32
    %92 = vector.broadcast %cst_42 : f32 to vector<8x128xf32>
    %93 = arith.addf %91, %92 : vector<8x128xf32>
    %94 = vector.extract_strided_slice %85 {offsets = [0, 128], sizes = [8, 128], strides = [1, 1]} : vector<8x512xf32> to vector<8x128xf32>
    %cst_43 = arith.constant 5.000000e-01 : f32
    %95 = vector.broadcast %cst_43 : f32 to vector<8x128xf32>
    %96 = arith.mulf %95, %94 : vector<8x128xf32>
    %97 = math.tanh %96 : vector<8x128xf32>
    %cst_44 = arith.constant 5.000000e-01 : f32
    %98 = vector.broadcast %cst_44 : f32 to vector<8x128xf32>
    %99 = arith.mulf %98, %97 : vector<8x128xf32>
    %cst_45 = arith.constant 5.000000e-01 : f32
    %100 = vector.broadcast %cst_45 : f32 to vector<8x128xf32>
    %101 = arith.addf %99, %100 : vector<8x128xf32>
    %102 = vector.extract_strided_slice %85 {offsets = [0, 256], sizes = [8, 128], strides = [1, 1]} : vector<8x512xf32> to vector<8x128xf32>
    %103 = math.tanh %102 : vector<8x128xf32>
    %104 = vector.extract_strided_slice %85 {offsets = [0, 384], sizes = [8, 128], strides = [1, 1]} : vector<8x512xf32> to vector<8x128xf32>
    %cst_46 = arith.constant 5.000000e-01 : f32
    %105 = vector.broadcast %cst_46 : f32 to vector<8x128xf32>
    %106 = arith.mulf %105, %104 : vector<8x128xf32>
    %107 = math.tanh %106 : vector<8x128xf32>
    %cst_47 = arith.constant 5.000000e-01 : f32
    %108 = vector.broadcast %cst_47 : f32 to vector<8x128xf32>
    %109 = arith.mulf %108, %107 : vector<8x128xf32>
    %cst_48 = arith.constant 5.000000e-01 : f32
    %110 = vector.broadcast %cst_48 : f32 to vector<8x128xf32>
    %111 = arith.addf %109, %110 : vector<8x128xf32>
    %112 = arith.mulf %101, %78 : vector<8x128xf32>
    %113 = arith.mulf %93, %103 : vector<8x128xf32>
    %114 = arith.addf %112, %113 : vector<8x128xf32>
    %115 = math.tanh %114 : vector<8x128xf32>
    %116 = arith.mulf %111, %115 : vector<8x128xf32>
    %c24 = arith.constant 24 : index
    %c0_49 = arith.constant 0 : index
    %117 = vector.load %arg9[%c24, %c0_49] : memref<64x512xf32, #tpu.memory_space<vmem>>, vector<8x512xf32>
    %118 = arith.truncf %116 : vector<8x128xf32> to vector<8x128xbf16>
    %c0_50 = arith.constant 0 : index
    %c0_51 = arith.constant 0 : index
    %119 = vector.load %arg3[%c0_50, %c0_51] : memref<128x512xbf16, #tpu.memory_space<vmem>>, vector<128x512xbf16>
    %cst_52 = arith.constant dense<0.000000e+00> : vector<8x512xf32>
    %120 = tpu.matmul %118, %119, %cst_52 {dimension_numbers = #tpu.dot_dimension_numbers<[1], [0], [0], [1], [0, 0, 1, 1], [], []>} : vector<8x128xbf16>, vector<128x512xbf16>, vector<8x512xf32> -> vector<8x512xf32>
    %121 = arith.addf %117, %120 : vector<8x512xf32>
    %122 = vector.extract_strided_slice %121 {offsets = [0, 0], sizes = [8, 128], strides = [1, 1]} : vector<8x512xf32> to vector<8x128xf32>
    %cst_53 = arith.constant 5.000000e-01 : f32
    %123 = vector.broadcast %cst_53 : f32 to vector<8x128xf32>
    %124 = arith.mulf %123, %122 : vector<8x128xf32>
    %125 = math.tanh %124 : vector<8x128xf32>
    %cst_54 = arith.constant 5.000000e-01 : f32
    %126 = vector.broadcast %cst_54 : f32 to vector<8x128xf32>
    %127 = arith.mulf %126, %125 : vector<8x128xf32>
    %cst_55 = arith.constant 5.000000e-01 : f32
    %128 = vector.broadcast %cst_55 : f32 to vector<8x128xf32>
    %129 = arith.addf %127, %128 : vector<8x128xf32>
    %130 = vector.extract_strided_slice %121 {offsets = [0, 128], sizes = [8, 128], strides = [1, 1]} : vector<8x512xf32> to vector<8x128xf32>
    %cst_56 = arith.constant 5.000000e-01 : f32
    %131 = vector.broadcast %cst_56 : f32 to vector<8x128xf32>
    %132 = arith.mulf %131, %130 : vector<8x128xf32>
    %133 = math.tanh %132 : vector<8x128xf32>
    %cst_57 = arith.constant 5.000000e-01 : f32
    %134 = vector.broadcast %cst_57 : f32 to vector<8x128xf32>
    %135 = arith.mulf %134, %133 : vector<8x128xf32>
    %cst_58 = arith.constant 5.000000e-01 : f32
    %136 = vector.broadcast %cst_58 : f32 to vector<8x128xf32>
    %137 = arith.addf %135, %136 : vector<8x128xf32>
    %138 = vector.extract_strided_slice %121 {offsets = [0, 256], sizes = [8, 128], strides = [1, 1]} : vector<8x512xf32> to vector<8x128xf32>
    %139 = math.tanh %138 : vector<8x128xf32>
    %140 = vector.extract_strided_slice %121 {offsets = [0, 384], sizes = [8, 128], strides = [1, 1]} : vector<8x512xf32> to vector<8x128xf32>
    %cst_59 = arith.constant 5.000000e-01 : f32
    %141 = vector.broadcast %cst_59 : f32 to vector<8x128xf32>
    %142 = arith.mulf %141, %140 : vector<8x128xf32>
    %143 = math.tanh %142 : vector<8x128xf32>
    %cst_60 = arith.constant 5.000000e-01 : f32
    %144 = vector.broadcast %cst_60 : f32 to vector<8x128xf32>
    %145 = arith.mulf %144, %143 : vector<8x128xf32>
    %cst_61 = arith.constant 5.000000e-01 : f32
    %146 = vector.broadcast %cst_61 : f32 to vector<8x128xf32>
    %147 = arith.addf %145, %146 : vector<8x128xf32>
    %148 = arith.mulf %137, %114 : vector<8x128xf32>
    %149 = arith.mulf %129, %139 : vector<8x128xf32>
    %150 = arith.addf %148, %149 : vector<8x128xf32>
    %151 = math.tanh %150 : vector<8x128xf32>
    %152 = arith.mulf %147, %151 : vector<8x128xf32>
    %c32 = arith.constant 32 : index
    %c0_62 = arith.constant 0 : index
    %153 = vector.load %arg9[%c32, %c0_62] : memref<64x512xf32, #tpu.memory_space<vmem>>, vector<8x512xf32>
    %154 = arith.truncf %152 : vector<8x128xf32> to vector<8x128xbf16>
    %c0_63 = arith.constant 0 : index
    %c0_64 = arith.constant 0 : index
    %155 = vector.load %arg3[%c0_63, %c0_64] : memref<128x512xbf16, #tpu.memory_space<vmem>>, vector<128x512xbf16>
    %cst_65 = arith.constant dense<0.000000e+00> : vector<8x512xf32>
    %156 = tpu.matmul %154, %155, %cst_65 {dimension_numbers = #tpu.dot_dimension_numbers<[1], [0], [0], [1], [0, 0, 1, 1], [], []>} : vector<8x128xbf16>, vector<128x512xbf16>, vector<8x512xf32> -> vector<8x512xf32>
    %157 = arith.addf %153, %156 : vector<8x512xf32>
    %158 = vector.extract_strided_slice %157 {offsets = [0, 0], sizes = [8, 128], strides = [1, 1]} : vector<8x512xf32> to vector<8x128xf32>
    %cst_66 = arith.constant 5.000000e-01 : f32
    %159 = vector.broadcast %cst_66 : f32 to vector<8x128xf32>
    %160 = arith.mulf %159, %158 : vector<8x128xf32>
    %161 = math.tanh %160 : vector<8x128xf32>
    %cst_67 = arith.constant 5.000000e-01 : f32
    %162 = vector.broadcast %cst_67 : f32 to vector<8x128xf32>
    %163 = arith.mulf %162, %161 : vector<8x128xf32>
    %cst_68 = arith.constant 5.000000e-01 : f32
    %164 = vector.broadcast %cst_68 : f32 to vector<8x128xf32>
    %165 = arith.addf %163, %164 : vector<8x128xf32>
    %166 = vector.extract_strided_slice %157 {offsets = [0, 128], sizes = [8, 128], strides = [1, 1]} : vector<8x512xf32> to vector<8x128xf32>
    %cst_69 = arith.constant 5.000000e-01 : f32
    %167 = vector.broadcast %cst_69 : f32 to vector<8x128xf32>
    %168 = arith.mulf %167, %166 : vector<8x128xf32>
    %169 = math.tanh %168 : vector<8x128xf32>
    %cst_70 = arith.constant 5.000000e-01 : f32
    %170 = vector.broadcast %cst_70 : f32 to vector<8x128xf32>
    %171 = arith.mulf %170, %169 : vector<8x128xf32>
    %cst_71 = arith.constant 5.000000e-01 : f32
    %172 = vector.broadcast %cst_71 : f32 to vector<8x128xf32>
    %173 = arith.addf %171, %172 : vector<8x128xf32>
    %174 = vector.extract_strided_slice %157 {offsets = [0, 256], sizes = [8, 128], strides = [1, 1]} : vector<8x512xf32> to vector<8x128xf32>
    %175 = math.tanh %174 : vector<8x128xf32>
    %176 = vector.extract_strided_slice %157 {offsets = [0, 384], sizes = [8, 128], strides = [1, 1]} : vector<8x512xf32> to vector<8x128xf32>
    %cst_72 = arith.constant 5.000000e-01 : f32
    %177 = vector.broadcast %cst_72 : f32 to vector<8x128xf32>
    %178 = arith.mulf %177, %176 : vector<8x128xf32>
    %179 = math.tanh %178 : vector<8x128xf32>
    %cst_73 = arith.constant 5.000000e-01 : f32
    %180 = vector.broadcast %cst_73 : f32 to vector<8x128xf32>
    %181 = arith.mulf %180, %179 : vector<8x128xf32>
    %cst_74 = arith.constant 5.000000e-01 : f32
    %182 = vector.broadcast %cst_74 : f32 to vector<8x128xf32>
    %183 = arith.addf %181, %182 : vector<8x128xf32>
    %184 = arith.mulf %173, %150 : vector<8x128xf32>
    %185 = arith.mulf %165, %175 : vector<8x128xf32>
    %186 = arith.addf %184, %185 : vector<8x128xf32>
    %187 = math.tanh %186 : vector<8x128xf32>
    %188 = arith.mulf %183, %187 : vector<8x128xf32>
    %c40 = arith.constant 40 : index
    %c0_75 = arith.constant 0 : index
    %189 = vector.load %arg9[%c40, %c0_75] : memref<64x512xf32, #tpu.memory_space<vmem>>, vector<8x512xf32>
    %190 = arith.truncf %188 : vector<8x128xf32> to vector<8x128xbf16>
    %c0_76 = arith.constant 0 : index
    %c0_77 = arith.constant 0 : index
    %191 = vector.load %arg3[%c0_76, %c0_77] : memref<128x512xbf16, #tpu.memory_space<vmem>>, vector<128x512xbf16>
    %cst_78 = arith.constant dense<0.000000e+00> : vector<8x512xf32>
    %192 = tpu.matmul %190, %191, %cst_78 {dimension_numbers = #tpu.dot_dimension_numbers<[1], [0], [0], [1], [0, 0, 1, 1], [], []>} : vector<8x128xbf16>, vector<128x512xbf16>, vector<8x512xf32> -> vector<8x512xf32>
    %193 = arith.addf %189, %192 : vector<8x512xf32>
    %194 = vector.extract_strided_slice %193 {offsets = [0, 0], sizes = [8, 128], strides = [1, 1]} : vector<8x512xf32> to vector<8x128xf32>
    %cst_79 = arith.constant 5.000000e-01 : f32
    %195 = vector.broadcast %cst_79 : f32 to vector<8x128xf32>
    %196 = arith.mulf %195, %194 : vector<8x128xf32>
    %197 = math.tanh %196 : vector<8x128xf32>
    %cst_80 = arith.constant 5.000000e-01 : f32
    %198 = vector.broadcast %cst_80 : f32 to vector<8x128xf32>
    %199 = arith.mulf %198, %197 : vector<8x128xf32>
    %cst_81 = arith.constant 5.000000e-01 : f32
    %200 = vector.broadcast %cst_81 : f32 to vector<8x128xf32>
    %201 = arith.addf %199, %200 : vector<8x128xf32>
    %202 = vector.extract_strided_slice %193 {offsets = [0, 128], sizes = [8, 128], strides = [1, 1]} : vector<8x512xf32> to vector<8x128xf32>
    %cst_82 = arith.constant 5.000000e-01 : f32
    %203 = vector.broadcast %cst_82 : f32 to vector<8x128xf32>
    %204 = arith.mulf %203, %202 : vector<8x128xf32>
    %205 = math.tanh %204 : vector<8x128xf32>
    %cst_83 = arith.constant 5.000000e-01 : f32
    %206 = vector.broadcast %cst_83 : f32 to vector<8x128xf32>
    %207 = arith.mulf %206, %205 : vector<8x128xf32>
    %cst_84 = arith.constant 5.000000e-01 : f32
    %208 = vector.broadcast %cst_84 : f32 to vector<8x128xf32>
    %209 = arith.addf %207, %208 : vector<8x128xf32>
    %210 = vector.extract_strided_slice %193 {offsets = [0, 256], sizes = [8, 128], strides = [1, 1]} : vector<8x512xf32> to vector<8x128xf32>
    %211 = math.tanh %210 : vector<8x128xf32>
    %212 = vector.extract_strided_slice %193 {offsets = [0, 384], sizes = [8, 128], strides = [1, 1]} : vector<8x512xf32> to vector<8x128xf32>
    %cst_85 = arith.constant 5.000000e-01 : f32
    %213 = vector.broadcast %cst_85 : f32 to vector<8x128xf32>
    %214 = arith.mulf %213, %212 : vector<8x128xf32>
    %215 = math.tanh %214 : vector<8x128xf32>
    %cst_86 = arith.constant 5.000000e-01 : f32
    %216 = vector.broadcast %cst_86 : f32 to vector<8x128xf32>
    %217 = arith.mulf %216, %215 : vector<8x128xf32>
    %cst_87 = arith.constant 5.000000e-01 : f32
    %218 = vector.broadcast %cst_87 : f32 to vector<8x128xf32>
    %219 = arith.addf %217, %218 : vector<8x128xf32>
    %220 = arith.mulf %209, %186 : vector<8x128xf32>
    %221 = arith.mulf %201, %211 : vector<8x128xf32>
    %222 = arith.addf %220, %221 : vector<8x128xf32>
    %223 = math.tanh %222 : vector<8x128xf32>
    %224 = arith.mulf %219, %223 : vector<8x128xf32>
    %c48 = arith.constant 48 : index
    %c0_88 = arith.constant 0 : index
    %225 = vector.load %arg9[%c48, %c0_88] : memref<64x512xf32, #tpu.memory_space<vmem>>, vector<8x512xf32>
    %226 = arith.truncf %224 : vector<8x128xf32> to vector<8x128xbf16>
    %c0_89 = arith.constant 0 : index
    %c0_90 = arith.constant 0 : index
    %227 = vector.load %arg3[%c0_89, %c0_90] : memref<128x512xbf16, #tpu.memory_space<vmem>>, vector<128x512xbf16>
    %cst_91 = arith.constant dense<0.000000e+00> : vector<8x512xf32>
    %228 = tpu.matmul %226, %227, %cst_91 {dimension_numbers = #tpu.dot_dimension_numbers<[1], [0], [0], [1], [0, 0, 1, 1], [], []>} : vector<8x128xbf16>, vector<128x512xbf16>, vector<8x512xf32> -> vector<8x512xf32>
    %229 = arith.addf %225, %228 : vector<8x512xf32>
    %230 = vector.extract_strided_slice %229 {offsets = [0, 0], sizes = [8, 128], strides = [1, 1]} : vector<8x512xf32> to vector<8x128xf32>
    %cst_92 = arith.constant 5.000000e-01 : f32
    %231 = vector.broadcast %cst_92 : f32 to vector<8x128xf32>
    %232 = arith.mulf %231, %230 : vector<8x128xf32>
    %233 = math.tanh %232 : vector<8x128xf32>
    %cst_93 = arith.constant 5.000000e-01 : f32
    %234 = vector.broadcast %cst_93 : f32 to vector<8x128xf32>
    %235 = arith.mulf %234, %233 : vector<8x128xf32>
    %cst_94 = arith.constant 5.000000e-01 : f32
    %236 = vector.broadcast %cst_94 : f32 to vector<8x128xf32>
    %237 = arith.addf %235, %236 : vector<8x128xf32>
    %238 = vector.extract_strided_slice %229 {offsets = [0, 128], sizes = [8, 128], strides = [1, 1]} : vector<8x512xf32> to vector<8x128xf32>
    %cst_95 = arith.constant 5.000000e-01 : f32
    %239 = vector.broadcast %cst_95 : f32 to vector<8x128xf32>
    %240 = arith.mulf %239, %238 : vector<8x128xf32>
    %241 = math.tanh %240 : vector<8x128xf32>
    %cst_96 = arith.constant 5.000000e-01 : f32
    %242 = vector.broadcast %cst_96 : f32 to vector<8x128xf32>
    %243 = arith.mulf %242, %241 : vector<8x128xf32>
    %cst_97 = arith.constant 5.000000e-01 : f32
    %244 = vector.broadcast %cst_97 : f32 to vector<8x128xf32>
    %245 = arith.addf %243, %244 : vector<8x128xf32>
    %246 = vector.extract_strided_slice %229 {offsets = [0, 256], sizes = [8, 128], strides = [1, 1]} : vector<8x512xf32> to vector<8x128xf32>
    %247 = math.tanh %246 : vector<8x128xf32>
    %248 = vector.extract_strided_slice %229 {offsets = [0, 384], sizes = [8, 128], strides = [1, 1]} : vector<8x512xf32> to vector<8x128xf32>
    %cst_98 = arith.constant 5.000000e-01 : f32
    %249 = vector.broadcast %cst_98 : f32 to vector<8x128xf32>
    %250 = arith.mulf %249, %248 : vector<8x128xf32>
    %251 = math.tanh %250 : vector<8x128xf32>
    %cst_99 = arith.constant 5.000000e-01 : f32
    %252 = vector.broadcast %cst_99 : f32 to vector<8x128xf32>
    %253 = arith.mulf %252, %251 : vector<8x128xf32>
    %cst_100 = arith.constant 5.000000e-01 : f32
    %254 = vector.broadcast %cst_100 : f32 to vector<8x128xf32>
    %255 = arith.addf %253, %254 : vector<8x128xf32>
    %256 = arith.mulf %245, %222 : vector<8x128xf32>
    %257 = arith.mulf %237, %247 : vector<8x128xf32>
    %258 = arith.addf %256, %257 : vector<8x128xf32>
    %259 = math.tanh %258 : vector<8x128xf32>
    %260 = arith.mulf %255, %259 : vector<8x128xf32>
    %c56 = arith.constant 56 : index
    %c0_101 = arith.constant 0 : index
    %261 = vector.load %arg9[%c56, %c0_101] : memref<64x512xf32, #tpu.memory_space<vmem>>, vector<8x512xf32>
    %262 = arith.truncf %260 : vector<8x128xf32> to vector<8x128xbf16>
    %c0_102 = arith.constant 0 : index
    %c0_103 = arith.constant 0 : index
    %263 = vector.load %arg3[%c0_102, %c0_103] : memref<128x512xbf16, #tpu.memory_space<vmem>>, vector<128x512xbf16>
    %cst_104 = arith.constant dense<0.000000e+00> : vector<8x512xf32>
    %264 = tpu.matmul %262, %263, %cst_104 {dimension_numbers = #tpu.dot_dimension_numbers<[1], [0], [0], [1], [0, 0, 1, 1], [], []>} : vector<8x128xbf16>, vector<128x512xbf16>, vector<8x512xf32> -> vector<8x512xf32>
    %265 = arith.addf %261, %264 : vector<8x512xf32>
    %266 = vector.extract_strided_slice %265 {offsets = [0, 0], sizes = [8, 128], strides = [1, 1]} : vector<8x512xf32> to vector<8x128xf32>
    %cst_105 = arith.constant 5.000000e-01 : f32
    %267 = vector.broadcast %cst_105 : f32 to vector<8x128xf32>
    %268 = arith.mulf %267, %266 : vector<8x128xf32>
    %269 = math.tanh %268 : vector<8x128xf32>
    %cst_106 = arith.constant 5.000000e-01 : f32
    %270 = vector.broadcast %cst_106 : f32 to vector<8x128xf32>
    %271 = arith.mulf %270, %269 : vector<8x128xf32>
    %cst_107 = arith.constant 5.000000e-01 : f32
    %272 = vector.broadcast %cst_107 : f32 to vector<8x128xf32>
    %273 = arith.addf %271, %272 : vector<8x128xf32>
    %274 = vector.extract_strided_slice %265 {offsets = [0, 128], sizes = [8, 128], strides = [1, 1]} : vector<8x512xf32> to vector<8x128xf32>
    %cst_108 = arith.constant 5.000000e-01 : f32
    %275 = vector.broadcast %cst_108 : f32 to vector<8x128xf32>
    %276 = arith.mulf %275, %274 : vector<8x128xf32>
    %277 = math.tanh %276 : vector<8x128xf32>
    %cst_109 = arith.constant 5.000000e-01 : f32
    %278 = vector.broadcast %cst_109 : f32 to vector<8x128xf32>
    %279 = arith.mulf %278, %277 : vector<8x128xf32>
    %cst_110 = arith.constant 5.000000e-01 : f32
    %280 = vector.broadcast %cst_110 : f32 to vector<8x128xf32>
    %281 = arith.addf %279, %280 : vector<8x128xf32>
    %282 = vector.extract_strided_slice %265 {offsets = [0, 256], sizes = [8, 128], strides = [1, 1]} : vector<8x512xf32> to vector<8x128xf32>
    %283 = math.tanh %282 : vector<8x128xf32>
    %284 = vector.extract_strided_slice %265 {offsets = [0, 384], sizes = [8, 128], strides = [1, 1]} : vector<8x512xf32> to vector<8x128xf32>
    %cst_111 = arith.constant 5.000000e-01 : f32
    %285 = vector.broadcast %cst_111 : f32 to vector<8x128xf32>
    %286 = arith.mulf %285, %284 : vector<8x128xf32>
    %287 = math.tanh %286 : vector<8x128xf32>
    %cst_112 = arith.constant 5.000000e-01 : f32
    %288 = vector.broadcast %cst_112 : f32 to vector<8x128xf32>
    %289 = arith.mulf %288, %287 : vector<8x128xf32>
    %cst_113 = arith.constant 5.000000e-01 : f32
    %290 = vector.broadcast %cst_113 : f32 to vector<8x128xf32>
    %291 = arith.addf %289, %290 : vector<8x128xf32>
    %292 = arith.mulf %281, %258 : vector<8x128xf32>
    %293 = arith.mulf %273, %283 : vector<8x128xf32>
    %294 = arith.addf %292, %293 : vector<8x128xf32>
    %295 = math.tanh %294 : vector<8x128xf32>
    %296 = arith.mulf %291, %295 : vector<8x128xf32>
    %297 = arith.truncf %296 : vector<8x128xf32> to vector<8x128xbf16>
    %c0_114 = arith.constant 0 : index
    %c0_115 = arith.constant 0 : index
    %298 = vector.load %arg4[%c0_114, %c0_115] : memref<128x256xbf16, #tpu.memory_space<vmem>>, vector<128x256xbf16>
    %cst_116 = arith.constant dense<0.000000e+00> : vector<8x256xf32>
    %299 = tpu.matmul %297, %298, %cst_116 {dimension_numbers = #tpu.dot_dimension_numbers<[1], [0], [0], [1], [0, 0, 1, 1], [], []>} : vector<8x128xbf16>, vector<128x256xbf16>, vector<8x256xf32> -> vector<8x256xf32>
    %c0_117 = arith.constant 0 : index
    %c0_118 = arith.constant 0 : index
    %300 = vector.load %arg5[%c0_117, %c0_118] : memref<1x256xf32, #tpu.memory_space<vmem>>, vector<1x256xf32>
    %301 = vector.broadcast %300 : vector<1x256xf32> to vector<8x256xf32>
    %302 = arith.addf %299, %301 : vector<8x256xf32>
    %cst_119 = arith.constant 0.000000e+00 : f32
    %303 = vector.broadcast %cst_119 : f32 to vector<8x256xf32>
    %304 = arith.maximumf %302, %303 : vector<8x256xf32>
    %305 = arith.truncf %304 : vector<8x256xf32> to vector<8x256xbf16>
    %c0_120 = arith.constant 0 : index
    %c0_121 = arith.constant 0 : index
    %306 = vector.load %arg6[%c0_120, %c0_121] : memref<256x256xbf16, #tpu.memory_space<vmem>>, vector<256x256xbf16>
    %cst_122 = arith.constant dense<0.000000e+00> : vector<8x256xf32>
    %307 = tpu.matmul %305, %306, %cst_122 {dimension_numbers = #tpu.dot_dimension_numbers<[1], [0], [0], [1], [0, 0, 1, 1], [], []>} : vector<8x256xbf16>, vector<256x256xbf16>, vector<8x256xf32> -> vector<8x256xf32>
    %c0_123 = arith.constant 0 : index
    %c0_124 = arith.constant 0 : index
    %308 = vector.load %arg7[%c0_123, %c0_124] : memref<1x256xf32, #tpu.memory_space<vmem>>, vector<1x256xf32>
    %309 = vector.broadcast %308 : vector<1x256xf32> to vector<8x256xf32>
    %310 = arith.addf %307, %309 : vector<8x256xf32>
    %c0_125 = arith.constant 0 : index
    %c0_126 = arith.constant 0 : index
    %311 = vector.load %arg8[%c0_125, %c0_126] : memref<8x256xf32, #tpu.memory_space<vmem>>, vector<8x256xf32>
    tpu.vector_store %arg8[%c0_125, %c0_126], %310 {strides = array<i32>} : memref<8x256xf32, #tpu.memory_space<vmem>>, vector<8x256xf32>,
    return
  }
}

</mosaic_0001>

<bundles_post_ra>
// kernel: prototype_to_action_forward.1
= control target key start
LH: loop header
LB: loop body
LE: loop exit
PB: predicated region body
PF: predicated region fallthrough
CT: control target
= control target key end

     0   :  { %13 = vsyncpa [#allocation4], 0  ;;  %s3706_s0 = inlined_call_operand.vmem [shape: bf16[64,256], index: 0, kind: input, shape index: {}]   ;;  %s3707_s1 = inlined_call_operand.hbm [shape: bf16[256,512], index: 1, kind: input, shape index: {}]   ;;  %s3708_s2 = inlined_call_operand.vmem [shape: f32[1,512], index: 2, kind: input, shape index: {}]   ;;  %s3709_s3 = inlined_call_operand.hbm [shape: bf16[128,512], index: 3, kind: input, shape index: {}]   ;;  %s3710_s4 = inlined_call_operand.vmem [shape: bf16[128,256], index: 4, kind: input, shape index: {}]   ;;  %s3711_s5 = inlined_call_operand.vmem [shape: f32[1,256], index: 5, kind: input, shape index: {}]   ;;  %s3712_s6 = inlined_call_operand.hbm [shape: bf16[256,256], index: 6, kind: input, shape index: {}]   ;;  %s3713_s7 = inlined_call_operand.vmem [shape: f32[1,256], index: 7, kind: input, shape index: {}]   ;;  %s3714_s8 = inlined_call_operand.vmem [shape: f32[8,256], index: 8, kind: output, shape index: {}]  }
   0x1   :  { %14 = vsyncpa [#allocation6], 0  ;;  %s36_s29 = sshll.u32 %s3709_s3, 4  ;;  %s2921_s30 = smov [#allocation5]   ;;  %s37_s29 = int_to_ptr.hbm [resolvable:$true] %s36_s29 }
   0x2   :  { %s38_s9 = sshll.u32 %s2921_s30, 4  ;;  %s21_s12 = sshll.u32 %s3707_s1, 4  ;;  %s39_s9 = int_to_ptr.vmem [resolvable:$true] %s38_s9  ;;  %s22_s12 = int_to_ptr.hbm [resolvable:$true] %s21_s12 }
   0x3   :  { %s2922_s13 = smov 256   ;;  %s2923_s14 = smov 16  }
   0x4   :  { %44 = dma.hbm_to_vmem [thread:$0]  %s37_s29, 4096, %s39_s9, [#allocation6], %s2922_s13, %s2922_s13, %s2923_s14  }
   0x5   :  { %s2924_s15 = smov [#allocation3]   ;;  %s53_s19 = sshll.u32 %s3712_s6, 4  ;;  %s54_s19 = int_to_ptr.hbm [resolvable:$true] %s53_s19 }
   0x6   :  { %s23_s16 = sshll.u32 %s2924_s15, 4  ;;  %s2925_s3 = smov [#allocation7]   ;;  %s24_s16 = int_to_ptr.vmem [resolvable:$true] %s23_s16 }
   0x7   :  { %29 = dma.hbm_to_vmem [thread:$0]  %s22_s12, 8192, %s24_s16, [#allocation4], %s2922_s13, %s2922_s13, %s2923_s14  }
   0x8   :  { %s55_s20 = sshll.u32 %s2925_s3, 4  ;;  %s2926_s21 = smov 128   ;;  %s56_s20 = int_to_ptr.vmem [resolvable:$true] %s55_s20 }
   0x9   :  { %s2927_s22 = smov 8  }
   0xa   :  { %61 = dma.hbm_to_vmem [thread:$0]  %s54_s19, 4096, %s56_s20, [#allocation6], %s2926_s21, %s2926_s21, %s2927_s22  }
   0xb   :  { %2917 = dma.done.wait [#allocation4], 8192  }
   0xc   :  { %2918 = vsyncadd [#allocation4], 4294959104 }
   0xd   :  { %2919 = dma.done.wait [#allocation6], 8192  }
   0xe   :  { %2920 = vsyncadd [#allocation6], 4294959104  ;;  %v2143_v0 = vld [vmem:[#allocation3 + $0xe0] sm:$0xf]  ;;  %v2643_v1 = vld [vmem:[#allocation3 + $0xec] sm:$0xf0] }
   0xf   :  { %v2271_v2 = vld [vmem:[#allocation3 + $0x1e0] sm:$0xf]  ;;  %v2144_v3 = vor.u32 %v2643_v1, %v2143_v0  ;;  %v2675_v4 = vld [vmem:[#allocation3 + $0x1ec] sm:$0xf0]  ;;  %v2641_v5 = vld [vmem:[#allocation3 + $0xe4] sm:$0xf] }
  0x10   :  { %v2145_v6 = vld [vmem:[#allocation3 + $0xf0] sm:$0xf0]  ;;  %v2272_v7 = vor.u32 %v2675_v4, %v2271_v2  ;;  %v2673_v9 = vld [vmem:[#allocation3 + $0x1e4] sm:$0xf]  ;;  %v2127_v11 = vld [vmem:[#allocation3 + $0xc0] sm:$0xf] }
  0x11   :  { %v2148_v8 = vor.u32 %v2641_v5, %v2145_v6  ;;  %v2273_v10 = vld [vmem:[#allocation3 + $0x1f0] sm:$0xf0]  ;;  %519 = vmatpush.bf16.msra.mxu0 %v2144_v3  ;;  %v2639_v13 = vld [vmem:[#allocation3 + $0xcc] sm:$0xf0]  ;;  %v2255_v14 = vld [vmem:[#allocation3 + $0x1c0] sm:$0xf] }
  0x12   :  { %v2276_v12 = vor.u32 %v2673_v9, %v2273_v10  ;;  %v2671_v15 = vld [vmem:[#allocation3 + $0x1cc] sm:$0xf0]  ;;  %548 = vmatpush.bf16.msra.mxu1 %v2272_v7  ;;  %v2128_v16 = vor.u32 %v2639_v13, %v2127_v11  ;;  %v2637_v18 = vld [vmem:[#allocation3 + $0xc4] sm:$0xf]  ;;  %v2129_v19 = vld [vmem:[#allocation3 + $0xd0] sm:$0xf0] }
  0x13   :  { %577 = vmatpush.bf16.msra.mxu2 %v2148_v8  ;;  %v2256_v17 = vor.u32 %v2671_v15, %v2255_v14  ;;  %v2669_v20 = vld [vmem:[#allocation3 + $0x1c4] sm:$0xf]  ;;  %v2132_v21 = vor.u32 %v2637_v18, %v2129_v19  ;;  %v2257_v22 = vld [vmem:[#allocation3 + $0x1d0] sm:$0xf0]  ;;  %v2111_v23 = vld [vmem:[#allocation3 + $0xa0] sm:$0xf] }
  0x14   :  { %606 = vmatpush.bf16.msra.mxu3 %v2276_v12  ;;  %v2635_v24 = vld [vmem:[#allocation3 + $0xac] sm:$0xf0]  ;;  %v2260_v25 = vor.u32 %v2669_v20, %v2257_v22  ;;  %v2239_v26 = vld [vmem:[#allocation3 + $0x1a0] sm:$0xf]  ;;  %v2633_v28 = vld [vmem:[#allocation3 + $0xa4] sm:$0xf] }
  0x15   :  { %v2667_v27 = vld [vmem:[#allocation3 + $0x1ac] sm:$0xf0]  ;;  %520 = vmatpush.bf16.msra.mxu0 %v2128_v16  ;;  %v2112_v29 = vor.u32 %v2635_v24, %v2111_v23  ;;  %v2113_v30 = vld [vmem:[#allocation3 + $0xb0] sm:$0xf0]  ;;  %v2665_v31 = vld [vmem:[#allocation3 + $0x1a4] sm:$0xf] }
  0x16   :  { %v2241_v32 = vld [vmem:[#allocation3 + $0x1b0] sm:$0xf0]  ;;  %549 = vmatpush.bf16.msra.mxu1 %v2256_v17  ;;  %v2240_v33 = vor.u32 %v2667_v27, %v2239_v26  ;;  %v2116_v34 = vor.u32 %v2633_v28, %v2113_v30  ;;  %v2095_v35 = vld [vmem:[#allocation3 + $0x80] sm:$0xf]  ;;  %v2631_v36 = vld [vmem:[#allocation3 + $0x8c] sm:$0xf0] }
  0x17   :  { %578 = vmatpush.bf16.msra.mxu2 %v2132_v21  ;;  %v2223_v37 = vld [vmem:[#allocation3 + $0x180] sm:$0xf]  ;;  %v2244_v38 = vor.u32 %v2665_v31, %v2241_v32  ;;  %v2663_v39 = vld [vmem:[#allocation3 + $0x18c] sm:$0xf0]  ;;  %v2629_v40 = vld [vmem:[#allocation3 + $0x84] sm:$0xf]  ;;  %v2096_v44 = vor.u32 %v2631_v36, %v2095_v35 }
  0x18   :  { %607 = vmatpush.bf16.msra.mxu3 %v2260_v25  ;;  %v2097_v41 = vld [vmem:[#allocation3 + $0x90] sm:$0xf0]  ;;  %v2661_v42 = vld [vmem:[#allocation3 + $0x184] sm:$0xf]  ;;  %v2224_v45 = vor.u32 %v2663_v39, %v2223_v37  ;;  %v2079_v47 = vld [vmem:[#allocation3 + $0x60] sm:$0xf] }
  0x19   :  { %v2225_v43 = vld [vmem:[#allocation3 + $0x190] sm:$0xf0]  ;;  %521 = vmatpush.bf16.msra.mxu0 %v2112_v29  ;;  %v2100_v46 = vor.u32 %v2629_v40, %v2097_v41  ;;  %v2627_v48 = vld [vmem:[#allocation3 + $0x6c] sm:$0xf0]  ;;  %v2207_v49 = vld [vmem:[#allocation3 + $0x160] sm:$0xf] }
  0x1a   :  { %550 = vmatpush.bf16.msra.mxu1 %v2240_v33  ;;  %v2228_v50 = vor.u32 %v2661_v42, %v2225_v43  ;;  %v2659_v51 = vld [vmem:[#allocation3 + $0x16c] sm:$0xf0]  ;;  %v2625_v52 = vld [vmem:[#allocation3 + $0x64] sm:$0xf]  ;;  %v2081_v53 = vld [vmem:[#allocation3 + $0x70] sm:$0xf0]  ;;  %v2080_v56 = vor.u32 %v2627_v48, %v2079_v47 }
  0x1b   :  { %579 = vmatpush.bf16.msra.mxu2 %v2116_v34  ;;  %v2657_v54 = vld [vmem:[#allocation3 + $0x164] sm:$0xf]  ;;  %v2209_v55 = vld [vmem:[#allocation3 + $0x170] sm:$0xf0]  ;;  %v2208_v57 = vor.u32 %v2659_v51, %v2207_v49  ;;  %v2084_v58 = vor.u32 %v2625_v52, %v2081_v53  ;;  %v2063_v59 = vld [vmem:[#allocation3 + $0x40] sm:$0xf] }
  0x1c   :  { %608 = vmatpush.bf16.msra.mxu3 %v2244_v38  ;;  %v2623_v60 = vld [vmem:[#allocation3 + $0x4c] sm:$0xf0]  ;;  %v2191_v61 = vld [vmem:[#allocation3 + $0x140] sm:$0xf]  ;;  %v2212_v62 = vor.u32 %v2657_v54, %v2209_v55  ;;  %v2621_v0 = vld [vmem:[#allocation3 + $0x44] sm:$0xf] }
  0x1d   :  { %522 = vmatpush.bf16.msra.mxu0 %v2096_v44  ;;  %v2655_v63 = vld [vmem:[#allocation3 + $0x14c] sm:$0xf0]  ;;  %v2065_v1 = vld [vmem:[#allocation3 + $0x50] sm:$0xf0]  ;;  %v2653_v2 = vld [vmem:[#allocation3 + $0x144] sm:$0xf]  ;;  %v2064_v4 = vor.u32 %v2623_v60, %v2063_v59 }
  0x1e   :  { %551 = vmatpush.bf16.msra.mxu1 %v2224_v45  ;;  %v2193_v3 = vld [vmem:[#allocation3 + $0x150] sm:$0xf0]  ;;  %v2192_v5 = vor.u32 %v2655_v63, %v2191_v61  ;;  %v2068_v6 = vor.u32 %v2621_v0, %v2065_v1  ;;  %v2047_v7 = vld [vmem:[#allocation3 + $0x20] sm:$0xf]  ;;  %v2619_v8 = vld [vmem:[#allocation3 + $0x2c] sm:$0xf0] }
  0x1f   :  { %580 = vmatpush.bf16.msra.mxu2 %v2100_v46  ;;  %v2175_v9 = vld [vmem:[#allocation3 + $0x120] sm:$0xf]  ;;  %v2196_v10 = vor.u32 %v2653_v2, %v2193_v3  ;;  %v2651_v11 = vld [vmem:[#allocation3 + $0x12c] sm:$0xf0]  ;;  %v2617_v12 = vld [vmem:[#allocation3 + $0x24] sm:$0xf]  ;;  %v2048_v16 = vor.u32 %v2619_v8, %v2047_v7 }
  0x20   :  { %609 = vmatpush.bf16.msra.mxu3 %v2228_v50  ;;  %v2049_v13 = vld [vmem:[#allocation3 + $0x30] sm:$0xf0]  ;;  %v2649_v14 = vld [vmem:[#allocation3 + $0x124] sm:$0xf]  ;;  %v2031_v17 = vld [vmem:[#allocation3] sm:$0xf]  ;;  %v2176_v19 = vor.u32 %v2651_v11, %v2175_v9 }
  0x21   :  { %523 = vmatpush.bf16.msra.mxu0 %v2080_v56  ;;  %v2177_v15 = vld [vmem:[#allocation3 + $0x130] sm:$0xf0]  ;;  %v2615_v18 = vld [vmem:[#allocation3 + $0xc] sm:$0xf0]  ;;  %v2052_v20 = vor.u32 %v2617_v12, %v2049_v13  ;;  %v2159_v21 = vld [vmem:[#allocation3 + $0x100] sm:$0xf] }
  0x22   :  { %552 = vmatpush.bf16.msra.mxu1 %v2208_v57  ;;  %v2647_v22 = vld [vmem:[#allocation3 + $0x10c] sm:$0xf0]  ;;  %v2613_v23 = vld [vmem:[#allocation3 + $0x4] sm:$0xf]  ;;  %v2180_v24 = vor.u32 %v2649_v14, %v2177_v15  ;;  %v2033_v25 = vld [vmem:[#allocation3 + $0x10] sm:$0xf0]  ;;  %v2032_v31 = vor.u32 %v2615_v18, %v2031_v17 }
  0x23   :  { %581 = vmatpush.bf16.msra.mxu2 %v2084_v58  ;;  %v2645_v26 = vld [vmem:[#allocation3 + $0x104] sm:$0xf]  ;;  %v2161_v27 = vld [vmem:[#allocation3 + $0x110] sm:$0xf0]  ;;  %v1999_v28 = vld [vmem:[%s3706_s0] sm:$0xf]  ;;  %v2160_v35 = vor.u32 %v2647_v22, %v2159_v21  ;;  %v2036_v36 = vor.u32 %v2613_v23, %v2033_v25 }
  0x24   :  { %610 = vmatpush.bf16.msra.mxu3 %v2212_v62  ;;  %v2151_v29 = vld [vmem:[#allocation3 + $0xe8] sm:$0xf]  ;;  %v2644_v30 = vld [vmem:[#allocation3 + $0xf4] sm:$0xf0]  ;;  %v2605_v37 = vld [vmem:[%s3706_s0 + $0x4] sm:$0xf]  ;;  %v2164_v39 = vor.u32 %v2645_v26, %v2161_v27 }
  0x25   :  { %524 = vmatpush.bf16.msra.mxu0 %v2064_v4  ;;  %v2606_v32 = vld [vmem:[%s3706_s0 + $0x4] sm:$0xf0]  ;;  %v2676_v34 = vld [vmem:[#allocation3 + $0x1f4] sm:$0xf0]  ;;  %v2001_v38 = vld [vmem:[%s3706_s0 + $0x8] sm:$0xf0]  ;;  %v2152_v40 = vor.u32 %v2644_v30, %v2151_v29 }
  0x26   :  { %553 = vmatpush.bf16.msra.mxu1 %v2192_v5  ;;  %v2279_v33 = vld [vmem:[#allocation3 + $0x1e8] sm:$0xf]  ;;  %v2642_v41 = vld [vmem:[#allocation3 + $0xec] sm:$0xf]  ;;  %v2153_v42 = vld [vmem:[#allocation3 + $0xf8] sm:$0xf0]  ;;  %v2995_v44 = vor.u32 %v2606_v32, %v1999_v28  ;;  %v2997_v49 = vor.u32 %v2605_v37, %v2001_v38 }
  0x27   :  { %582 = vmatpush.bf16.msra.mxu2 %v2068_v6  ;;  %v2674_v43 = vld [vmem:[#allocation3 + $0x1ec] sm:$0xf]  ;;  %v2280_v45 = vor.u32 %v2676_v34, %v2279_v33  ;;  %v2281_v46 = vld [vmem:[#allocation3 + $0x1f8] sm:$0xf0]  ;;  %v2135_v47 = vld [vmem:[#allocation3 + $0xc8] sm:$0xf]  ;;  %v2156_v52 = vor.u32 %v2642_v41, %v2153_v42 }
  0x28   :  { %611 = vmatpush.bf16.msra.mxu3 %v2196_v10  ;;  %v2640_v48 = vld [vmem:[#allocation3 + $0xd4] sm:$0xf0]  ;;  %v2263_v50 = vld [vmem:[#allocation3 + $0x1c8] sm:$0xf]  ;;  %v2284_v53 = vor.u32 %v2674_v43, %v2281_v46  ;;  %v2638_v55 = vld [vmem:[#allocation3 + $0xcc] sm:$0xf] }
  0x29   :  { %525 = vmatpush.bf16.msra.mxu0 %v2048_v16  ;;  %v2672_v51 = vld [vmem:[#allocation3 + $0x1d4] sm:$0xf0]  ;;  %v2136_v54 = vor.u32 %v2640_v48, %v2135_v47  ;;  %v2137_v56 = vld [vmem:[#allocation3 + $0xd8] sm:$0xf0]  ;;  %v2670_v57 = vld [vmem:[#allocation3 + $0x1cc] sm:$0xf] }
  0x2a   :  { %554 = vmatpush.bf16.msra.mxu1 %v2176_v19  ;;  %v2264_v58 = vor.u32 %v2672_v51, %v2263_v50  ;;  %v2265_v59 = vld [vmem:[#allocation3 + $0x1d8] sm:$0xf0]  ;;  %v2119_v60 = vld [vmem:[#allocation3 + $0xa8] sm:$0xf]  ;;  %v2636_v61 = vld [vmem:[#allocation3 + $0xb4] sm:$0xf0]  ;;  %v2140_v0 = vor.u32 %v2638_v55, %v2137_v56 }
  0x2b   :  { %583 = vmatpush.bf16.msra.mxu2 %v2052_v20  ;;  %v2247_v62 = vld [vmem:[#allocation3 + $0x1a8] sm:$0xf]  ;;  %v2668_v63 = vld [vmem:[#allocation3 + $0x1b4] sm:$0xf0]  ;;  %v2268_v1 = vor.u32 %v2670_v57, %v2265_v59  ;;  %v2120_v2 = vor.u32 %v2636_v61, %v2119_v60  ;;  %v2634_v3 = vld [vmem:[#allocation3 + $0xac] sm:$0xf] }
  0x2c   :  { %612 = vmatpush.bf16.msra.mxu3 %v2180_v24  ;;  %v2121_v4 = vld [vmem:[#allocation3 + $0xb8] sm:$0xf0]  ;;  %v2666_v5 = vld [vmem:[#allocation3 + $0x1ac] sm:$0xf]  ;;  %v2248_v6 = vor.u32 %v2668_v63, %v2247_v62  ;;  %v2103_v8 = vld [vmem:[#allocation3 + $0x88] sm:$0xf] }
  0x2d   :  { %526 = vmatpush.bf16.msra.mxu0 %v2032_v31  ;;  %v2249_v7 = vld [vmem:[#allocation3 + $0x1b8] sm:$0xf0]  ;;  %v2632_v9 = vld [vmem:[#allocation3 + $0x94] sm:$0xf0]  ;;  %v2231_v10 = vld [vmem:[#allocation3 + $0x188] sm:$0xf]  ;;  %v2124_v12 = vor.u32 %v2634_v3, %v2121_v4 }
  0x2e   :  { %555 = vmatpush.bf16.msra.mxu1 %v2160_v35  ;;  %v2664_v11 = vld [vmem:[#allocation3 + $0x194] sm:$0xf0]  ;;  %v2007_v13 = vld [vmem:[%s3706_s0 + $0x10] sm:$0xf]  ;;  %v2252_v14 = vor.u32 %v2666_v5, %v2249_v7  ;;  %v2104_v15 = vor.u32 %v2632_v9, %v2103_v8  ;;  %v2630_v16 = vld [vmem:[#allocation3 + $0x8c] sm:$0xf] }
  0x2f   :  { %584 = vmatpush.bf16.msra.mxu2 %v2036_v36  ;;  %v2105_v17 = vld [vmem:[#allocation3 + $0x98] sm:$0xf0]  ;;  %v2662_v18 = vld [vmem:[#allocation3 + $0x18c] sm:$0xf]  ;;  %v2232_v19 = vor.u32 %v2664_v11, %v2231_v10  ;;  %v2087_v21 = vld [vmem:[#allocation3 + $0x68] sm:$0xf] }
  0x30   :  { %613 = vmatpush.bf16.msra.mxu3 %v2164_v39  ;;  %527 = vmatmul.bf16.vlgmr.msra.gmra.mxu0 %v2995_v44  ;;  %v2233_v20 = vld [vmem:[#allocation3 + $0x198] sm:$0xf0]  ;;  %v2628_v22 = vld [vmem:[#allocation3 + $0x74] sm:$0xf0]  ;;  %v2215_v24 = vld [vmem:[#allocation3 + $0x168] sm:$0xf]  ;;  %v2108_v28 = vor.u32 %v2630_v16, %v2105_v17 }
  0x31   :  { %635 = vmatpush.bf16.msrb.mxu0 %v2152_v40  ;;  %556 = vmatmul.bf16.vlgmr.msra.gmra.mxu1 %v2997_v49  ;;  %v2608_v23 = vld [vmem:[%s3706_s0 + $0x14] sm:$0xf0]  ;;  %v2607_v26 = vld [vmem:[%s3706_s0 + $0x14] sm:$0xf]  ;;  %v2009_v27 = vld [vmem:[%s3706_s0 + $0x18] sm:$0xf0]  ;;  %v2236_v29 = vor.u32 %v2662_v18, %v2233_v20  ;;  %v2088_v30 = vor.u32 %v2628_v22, %v2087_v21 }
  0x32   :  { %664 = vmatpush.bf16.msrb.mxu1 %v2280_v45  ;;  %585 = vmatmul.bf16.vlgmr.msra.gmra.mxu2 %v2995_v44  ;;  %v2660_v25 = vld [vmem:[#allocation3 + $0x174] sm:$0xf0]  ;;  %v2626_v31 = vld [vmem:[#allocation3 + $0x6c] sm:$0xf]  ;;  %v2089_v32 = vld [vmem:[#allocation3 + $0x78] sm:$0xf0]  ;;  %v3015_v34 = vor.u32 %v2608_v23, %v2007_v13  ;;  %v3017_v39 = vor.u32 %v2607_v26, %v2009_v27 }
  0x33   :  { %614 = vmatmul.bf16.vlgmr.msra.gmra.mxu3 %v2997_v49  ;;  %693 = vmatpush.bf16.msrb.mxu2 %v2156_v52  ;;  %v2658_v33 = vld [vmem:[#allocation3 + $0x16c] sm:$0xf]  ;;  %v2216_v35 = vor.u32 %v2660_v25, %v2215_v24  ;;  %v2217_v36 = vld [vmem:[#allocation3 + $0x178] sm:$0xf0]  ;;  %v2071_v37 = vld [vmem:[#allocation3 + $0x48] sm:$0xf]  ;;  %v2092_v42 = vor.u32 %v2626_v31, %v2089_v32 }
  0x34   :  { %722 = vmatpush.bf16.msrb.mxu3 %v2284_v53  ;;  %v2624_v38 = vld [vmem:[#allocation3 + $0x54] sm:$0xf0]  ;;  %v2199_v40 = vld [vmem:[#allocation3 + $0x148] sm:$0xf]  ;;  %v2220_v43 = vor.u32 %v2658_v33, %v2217_v36  ;;  %v2622_v46 = vld [vmem:[#allocation3 + $0x4c] sm:$0xf] }
  0x35   :  { %636 = vmatpush.bf16.msrb.mxu0 %v2136_v54  ;;  %v2656_v41 = vld [vmem:[#allocation3 + $0x154] sm:$0xf0]  ;;  %v2072_v45 = vor.u32 %v2624_v38, %v2071_v37  ;;  %v2073_v47 = vld [vmem:[#allocation3 + $0x58] sm:$0xf0]  ;;  %v2654_v50 = vld [vmem:[#allocation3 + $0x14c] sm:$0xf] }
  0x36   :  { %665 = vmatpush.bf16.msrb.mxu1 %v2264_v58  ;;  %v2200_v48 = vor.u32 %v2656_v41, %v2199_v40  ;;  %v2201_v51 = vld [vmem:[#allocation3 + $0x158] sm:$0xf0]  ;;  %v2076_v52 = vor.u32 %v2622_v46, %v2073_v47  ;;  %v2055_v53 = vld [vmem:[#allocation3 + $0x28] sm:$0xf]  ;;  %v2620_v54 = vld [vmem:[#allocation3 + $0x34] sm:$0xf0] }
  0x37   :  { %694 = vmatpush.bf16.msrb.mxu2 %v2140_v0  ;;  %v2183_v55 = vld [vmem:[#allocation3 + $0x128] sm:$0xf]  ;;  %v2204_v56 = vor.u32 %v2654_v50, %v2201_v51  ;;  %v2056_v57 = vor.u32 %v2620_v54, %v2055_v53  ;;  %v2652_v58 = vld [vmem:[#allocation3 + $0x134] sm:$0xf0]  ;;  %v2618_v59 = vld [vmem:[#allocation3 + $0x2c] sm:$0xf] }
  0x38   :  { %723 = vmatpush.bf16.msrb.mxu3 %v2268_v1  ;;  %v2057_v60 = vld [vmem:[#allocation3 + $0x38] sm:$0xf0]  ;;  %v2184_v61 = vor.u32 %v2652_v58, %v2183_v55  ;;  %v2650_v62 = vld [vmem:[#allocation3 + $0x12c] sm:$0xf]  ;;  %v2039_v0 = vld [vmem:[#allocation3 + $0x8] sm:$0xf] }
  0x39   :  { %637 = vmatpush.bf16.msrb.mxu0 %v2120_v2  ;;  %v2185_v63 = vld [vmem:[#allocation3 + $0x138] sm:$0xf0]  ;;  %v2616_v1 = vld [vmem:[#allocation3 + $0x14] sm:$0xf0]  ;;  %v2167_v2 = vld [vmem:[#allocation3 + $0x108] sm:$0xf]  ;;  %v2060_v4 = vor.u32 %v2618_v59, %v2057_v60 }
  0x3a   :  { %666 = vmatpush.bf16.msrb.mxu1 %v2248_v6  ;;  %v2648_v3 = vld [vmem:[#allocation3 + $0x114] sm:$0xf0]  ;;  %v2188_v5 = vor.u32 %v2650_v62, %v2185_v63  ;;  %v2040_v6 = vor.u32 %v2616_v1, %v2039_v0  ;;  %v2614_v7 = vld [vmem:[#allocation3 + $0xc] sm:$0xf]  ;;  %v2041_v8 = vld [vmem:[#allocation3 + $0x18] sm:$0xf0] }
  0x3b   :  { %695 = vmatpush.bf16.msrb.mxu2 %v2124_v12  ;;  %v2168_v9 = vor.u32 %v2648_v3, %v2167_v2  ;;  %v2646_v10 = vld [vmem:[#allocation3 + $0x10c] sm:$0xf]  ;;  %v2169_v11 = vld [vmem:[#allocation3 + $0x118] sm:$0xf0]  ;;  %v2015_v12 = vld [vmem:[%s3706_s0 + $0x20] sm:$0xf]  ;;  %v2044_v16 = vor.u32 %v2614_v7, %v2041_v8 }
  0x3c   :  { %724 = vmatpush.bf16.msrb.mxu3 %v2252_v14  ;;  %v2610_v13 = vld [vmem:[%s3706_s0 + $0x24] sm:$0xf0]  ;;  %v2609_v14 = vld [vmem:[%s3706_s0 + $0x24] sm:$0xf]  ;;  %v2172_v17 = vor.u32 %v2646_v10, %v2169_v11  ;;  %v2399_v20 = vld [vmem:[#allocation5 + $0xe0] sm:$0xf] }
  0x3d   :  { %638 = vmatpush.bf16.msrb.mxu0 %v2104_v15  ;;  %v2017_v15 = vld [vmem:[%s3706_s0 + $0x28] sm:$0xf0]  ;;  %v3035_v18 = vor.u32 %v2610_v13, %v2015_v12  ;;  %v2707_v21 = vld [vmem:[#allocation5 + $0xec] sm:$0xf0]  ;;  %v2705_v22 = vld [vmem:[#allocation5 + $0xe4] sm:$0xf] }
  0x3e   :  { %667 = vmatpush.bf16.msrb.mxu1 %v2232_v19  ;;  %v3037_v19 = vor.u32 %v2609_v14, %v2017_v15  ;;  %v3043_v23 = vor.u32 %v2707_v21, %v2399_v20  ;;  %v2401_v24 = vld [vmem:[#allocation5 + $0xf0] sm:$0xf0]  ;;  %v2407_v25 = vld [vmem:[#allocation5 + $0xe8] sm:$0xf]  ;;  %v2708_v26 = vld [vmem:[#allocation5 + $0xf4] sm:$0xf0] }
  0x3f   :  { %696 = vmatpush.bf16.msrb.mxu2 %v2108_v28  ;;  %v3045_v27 = vor.u32 %v2705_v22, %v2401_v24  ;;  %v3047_v28 = vor.u32 %v2708_v26, %v2407_v25  ;;  %v2383_v31 = vld [vmem:[#allocation5 + $0xc0] sm:$0xf]  ;;  %v2703_v33 = vld [vmem:[#allocation5 + $0xcc] sm:$0xf0]  ;;  %v2385_v36 = vld [vmem:[#allocation5 + $0xd0] sm:$0xf0] }
  0x40   :  { %725 = vmatpush.bf16.msrb.mxu3 %v2236_v29  ;;  %532 = vmatmul.bf16.gmra.mxu0 %v3015_v34  ;;  %v2706_v29 = vld [vmem:[#allocation5 + $0xec] sm:$0xf]  ;;  %v3054_v37 = vor.u32 %v2703_v33, %v2383_v31  ;;  %v2391_v40 = vld [vmem:[#allocation5 + $0xc8] sm:$0xf]  ;;  %v2704_v41 = vld [vmem:[#allocation5 + $0xd4] sm:$0xf0] }
  0x41   :  { %639 = vmatpush.bf16.msrb.mxu0 %v2088_v30  ;;  %561 = vmatmul.bf16.gmra.mxu1 %v3017_v39  ;;  %v2409_v30 = vld [vmem:[#allocation5 + $0xf8] sm:$0xf0]  ;;  %v2023_v47 = vld [vmem:[%s3706_s0 + $0x30] sm:$0xf]  ;;  %v2611_v50 = vld [vmem:[%s3706_s0 + $0x34] sm:$0xf] }
  0x42   :  { %668 = vmatpush.bf16.msrb.mxu1 %v2216_v35  ;;  %590 = vmatmul.bf16.gmra.mxu2 %v3015_v34  ;;  %v3050_v32 = vor.u32 %v2706_v29, %v2409_v30  ;;  %v2701_v35 = vld [vmem:[#allocation5 + $0xc4] sm:$0xf]  ;;  %v2025_v51 = vld [vmem:[%s3706_s0 + $0x38] sm:$0xf0]  ;;  %v2367_v54 = vld [vmem:[#allocation5 + $0xa0] sm:$0xf] }
  0x43   :  { %619 = vmatmul.bf16.gmra.mxu3 %v3017_v39  ;;  %697 = vmatpush.bf16.msrb.mxu2 %v2092_v42  ;;  %v3056_v38 = vor.u32 %v2701_v35, %v2385_v36  ;;  %v2702_v42 = vld [vmem:[#allocation5 + $0xcc] sm:$0xf]  ;;  %v3081_v53 = vor.u32 %v2611_v50, %v2025_v51  ;;  %v2699_v55 = vld [vmem:[#allocation5 + $0xac] sm:$0xf0]  ;;  %v2369_v58 = vld [vmem:[#allocation5 + $0xb0] sm:$0xf0] }
  0x44   :  { %726 = vmatpush.bf16.msrb.mxu3 %v2220_v43  ;;  %v3059_v43 = vor.u32 %v2704_v41, %v2391_v40  ;;  %v2375_v59 = vld [vmem:[#allocation5 + $0xa8] sm:$0xf]  ;;  %v2700_v60 = vld [vmem:[#allocation5 + $0xb4] sm:$0xf0]  ;;  %v2698_v63 = vld [vmem:[#allocation5 + $0xac] sm:$0xf] }
  0x45   :  { %640 = vmatpush.bf16.msrb.mxu0 %v2072_v45  ;;  %v2393_v45 = vld [vmem:[#allocation5 + $0xd8] sm:$0xf0]  ;;  %v3091_v62 = vor.u32 %v2700_v60, %v2375_v59  ;;  %v2351_v1 = vld [vmem:[#allocation5 + $0x80] sm:$0xf]  ;;  %v2695_v3 = vld [vmem:[#allocation5 + $0x8c] sm:$0xf0] }
  0x46   :  { %669 = vmatpush.bf16.msrb.mxu1 %v2200_v48  ;;  %v3061_v46 = vor.u32 %v2702_v42, %v2393_v45  ;;  %v2612_v48 = vld [vmem:[%s3706_s0 + $0x34] sm:$0xf0]  ;;  %v2377_v0 = vld [vmem:[#allocation5 + $0xb8] sm:$0xf0]  ;;  %v2359_v8 = vld [vmem:[#allocation5 + $0x88] sm:$0xf] }
  0x47   :  { %698 = vmatpush.bf16.msrb.mxu2 %v2076_v52  ;;  %v3079_v52 = vor.u32 %v2612_v48, %v2023_v47  ;;  %v3094_v2 = vor.u32 %v2698_v63, %v2377_v0  ;;  %v2694_v10 = vld [vmem:[#allocation5 + $0x8c] sm:$0xf]  ;;  %v2361_v12 = vld [vmem:[#allocation5 + $0x98] sm:$0xf0]  ;;  %v2335_v14 = vld [vmem:[#allocation5 + $0x60] sm:$0xf] }
  0x48   :  { %727 = vmatpush.bf16.msrb.mxu3 %v2204_v56  ;;  %v2697_v56 = vld [vmem:[#allocation5 + $0xa4] sm:$0xf]  ;;  %v3105_v13 = vor.u32 %v2694_v10, %v2361_v12  ;;  %v2691_v15 = vld [vmem:[#allocation5 + $0x6c] sm:$0xf0]  ;;  %v2337_v20 = vld [vmem:[#allocation5 + $0x70] sm:$0xf0] }
  0x49   :  { %641 = vmatpush.bf16.msrb.mxu0 %v2056_v57  ;;  %v3087_v57 = vor.u32 %v2699_v55, %v2367_v54  ;;  %v2343_v21 = vld [vmem:[#allocation5 + $0x68] sm:$0xf]  ;;  %v2692_v22 = vld [vmem:[#allocation5 + $0x74] sm:$0xf0]  ;;  %v2690_v26 = vld [vmem:[#allocation5 + $0x6c] sm:$0xf] }
  0x4a   :  { %670 = vmatpush.bf16.msrb.mxu1 %v2184_v61  ;;  %v3089_v61 = vor.u32 %v2697_v56, %v2369_v58  ;;  %v3119_v25 = vor.u32 %v2692_v22, %v2343_v21  ;;  %v2345_v29 = vld [vmem:[#allocation5 + $0x78] sm:$0xf0]  ;;  %v2319_v30 = vld [vmem:[#allocation5 + $0x40] sm:$0xf]  ;;  %v2685_v31 = vld [vmem:[#allocation5 + $0x44] sm:$0xf] }
  0x4b   :  { %699 = vmatpush.bf16.msrb.mxu2 %v2060_v4  ;;  %v2693_v4 = vld [vmem:[#allocation5 + $0x84] sm:$0xf]  ;;  %v2321_v33 = vld [vmem:[#allocation5 + $0x50] sm:$0xf0]  ;;  %v2327_v40 = vld [vmem:[#allocation5 + $0x48] sm:$0xf] }
  0x4c   :  { %728 = vmatpush.bf16.msrb.mxu3 %v2188_v5  ;;  %v2353_v5 = vld [vmem:[#allocation5 + $0x90] sm:$0xf0]  ;;  %v3128_v36 = vor.u32 %v2685_v31, %v2321_v33  ;;  %v2688_v41 = vld [vmem:[#allocation5 + $0x54] sm:$0xf0]  ;;  %v2686_v42 = vld [vmem:[#allocation5 + $0x4c] sm:$0xf] }
  0x4d   :  { %642 = vmatpush.bf16.msrb.mxu0 %v2040_v6  ;;  %v3098_v6 = vor.u32 %v2695_v3, %v2351_v1  ;;  %v3100_v7 = vor.u32 %v2693_v4, %v2353_v5  ;;  %v3131_v45 = vor.u32 %v2688_v41, %v2327_v40  ;;  %v2329_v47 = vld [vmem:[#allocation5 + $0x58] sm:$0xf0]  ;;  %v2303_v50 = vld [vmem:[#allocation5 + $0x20] sm:$0xf]  ;;  %v2683_v51 = vld [vmem:[#allocation5 + $0x2c] sm:$0xf0] }
  0x4e   :  { %671 = vmatpush.bf16.msrb.mxu1 %v2168_v9  ;;  %v2696_v9 = vld [vmem:[#allocation5 + $0x94] sm:$0xf0]  ;;  %v3133_v48 = vor.u32 %v2686_v42, %v2329_v47  ;;  %v2681_v54 = vld [vmem:[#allocation5 + $0x24] sm:$0xf]  ;;  %v3143_v55 = vor.u32 %v2683_v51, %v2303_v50  ;;  %v2305_v56 = vld [vmem:[#allocation5 + $0x30] sm:$0xf0] }
  0x4f   :  { %700 = vmatpush.bf16.msrb.mxu2 %v2044_v16  ;;  %v3103_v11 = vor.u32 %v2696_v9, %v2359_v8  ;;  %v2689_v16 = vld [vmem:[#allocation5 + $0x64] sm:$0xf]  ;;  %v2311_v58 = vld [vmem:[#allocation5 + $0x28] sm:$0xf]  ;;  %v2684_v59 = vld [vmem:[#allocation5 + $0x34] sm:$0xf0]  ;;  %v3145_v60 = vor.u32 %v2681_v54, %v2305_v56 }
  0x50   :  { %729 = vmatpush.bf16.msrb.mxu3 %v2172_v17  ;;  %537 = vmatmul.bf16.gmra.mxu0 %v3035_v18  ;;  %v3115_v17 = vor.u32 %v2691_v15, %v2335_v14  ;;  %v3117_v24 = vor.u32 %v2689_v16, %v2337_v20  ;;  %v3147_v63 = vor.u32 %v2684_v59, %v2311_v58  ;;  %v2682_v0 = vld [vmem:[#allocation5 + $0x2c] sm:$0xf]  ;;  %v2313_v1 = vld [vmem:[#allocation5 + $0x38] sm:$0xf0]  ;;  %v2287_v3 = vld [vmem:[#allocation5] sm:$0xf] }
  0x51   :  { %566 = vmatmul.bf16.gmra.mxu1 %v3037_v19  ;;  %979 = vmatpush.bf16.msra.mxu0 %v3043_v23  ;;  %v2677_v4 = vld [vmem:[#allocation5 + $0x4] sm:$0xf]  ;;  %v2289_v5 = vld [vmem:[#allocation5 + $0x10] sm:$0xf0]  ;;  %v2295_v10 = vld [vmem:[#allocation5 + $0x8] sm:$0xf] }
  0x52   :  { %595 = vmatmul.bf16.gmra.mxu2 %v3035_v18  ;;  %992 = vmatpush.bf16.msra.mxu1 %v3045_v27  ;;  %v3156_v9 = vor.u32 %v2677_v4, %v2289_v5  ;;  %v2680_v12 = vld [vmem:[#allocation5 + $0x14] sm:$0xf0]  ;;  %v2678_v15 = vld [vmem:[#allocation5 + $0xc] sm:$0xf]  ;;  %v2297_v16 = vld [vmem:[#allocation5 + $0x18] sm:$0xf0] }
  0x53   :  { %624 = vmatmul.bf16.gmra.mxu3 %v3037_v19  ;;  %1005 = vmatpush.bf16.msra.mxu2 %v3047_v28  ;;  %v3159_v14 = vor.u32 %v2680_v12, %v2295_v10  ;;  %v3167_v20 = vor.u32 %v2678_v15, %v2297_v16 }
  0x54   :  { %1018 = vmatpush.bf16.msra.mxu3 %v3050_v32 }
  0x55   :  { %980 = vmatpush.bf16.msra.mxu0 %v3054_v37 }
  0x56   :  { %993 = vmatpush.bf16.msra.mxu1 %v3056_v38 }
  0x57   :  { %1006 = vmatpush.bf16.msra.mxu2 %v3059_v43 }
  0x58   :  { %1019 = vmatpush.bf16.msra.mxu3 %v3061_v46 }
  0x59   :  { %981 = vmatpush.bf16.msra.mxu0 %v3087_v57 }
  0x5a   :  { %994 = vmatpush.bf16.msra.mxu1 %v3089_v61 }
  0x5b   :  { %1007 = vmatpush.bf16.msra.mxu2 %v3091_v62 }
  0x5c   :  { %1020 = vmatpush.bf16.msra.mxu3 %v3094_v2 }
  0x5d   :  { %982 = vmatpush.bf16.msra.mxu0 %v3098_v6 }
  0x5e   :  { %995 = vmatpush.bf16.msra.mxu1 %v3100_v7 }
  0x5f   :  { %1008 = vmatpush.bf16.msra.mxu2 %v3103_v11 }
  0x60   :  { %542 = vmatmul.bf16.gmra.mxu0 %v3079_v52  ;;  %1021 = vmatpush.bf16.msra.mxu3 %v3105_v13 }
  0x61   :  { %571 = vmatmul.bf16.gmra.mxu1 %v3081_v53  ;;  %983 = vmatpush.bf16.msra.mxu0 %v3115_v17 }
  0x62   :  { %600 = vmatmul.bf16.gmra.mxu2 %v3079_v52  ;;  %996 = vmatpush.bf16.msra.mxu1 %v3117_v24 }
  0x63   :  { %629 = vmatmul.bf16.gmra.mxu3 %v3081_v53  ;;  %1009 = vmatpush.bf16.msra.mxu2 %v3119_v25 }
  0x66   :  { %997 = vmatpush.bf16.msra.mxu1 %v3128_v36 }
  0x67   :  { %1010 = vmatpush.bf16.msra.mxu2 %v3131_v45 }
  0x6a   :  { %998 = vmatpush.bf16.msra.mxu1 %v3145_v60 }
  0x6b   :  { %1011 = vmatpush.bf16.msra.mxu2 %v3147_v63 }
  0x6e   :  { %999 = vmatpush.bf16.msra.mxu1 %v3156_v9 }
  0x6f   :  { %1012 = vmatpush.bf16.msra.mxu2 %v3159_v14 }
  0x70   :  { %643 = vmatmul.bf16.vlgmr.msrb.gmra.mxu0 %v2995_v44 }
  0x71   :  { %672 = vmatmul.bf16.vlgmr.msrb.gmra.mxu1 %v2997_v49 }
  0x72   :  { %701 = vmatmul.bf16.vlgmr.msrb.gmra.mxu2 %v2995_v44  ;;  %v3122_v44 = vor.u32 %v2690_v26, %v2345_v29  ;;  %1071 = vmatpush.bf16.msrb.mxu1 %v3045_v27  ;;  %v2928_v26 = vmov 0  }
  0x73   :  { %730 = vmatmul.bf16.vlgmr.msrb.gmra.mxu3 %v2997_v49  ;;  %v2687_v49 = vld [vmem:[#allocation5 + $0x4c] sm:$0xf0]  ;;  %1084 = vmatpush.bf16.msrb.mxu2 %v3047_v28 }
  0x74   :  { %v3126_v35 = vor.u32 %v2687_v49, %v2319_v30  ;;  %1022 = vmatpush.bf16.msra.mxu3 %v3122_v44 }
  0x76   :  { %984 = vmatpush.bf16.msra.mxu0 %v3126_v35  ;;  %1072 = vmatpush.bf16.msrb.mxu1 %v3056_v38 }
  0x77   :  { %1085 = vmatpush.bf16.msrb.mxu2 %v3059_v43 }
  0x78   :  { %1023 = vmatpush.bf16.msra.mxu3 %v3133_v48 }
  0x7a   :  { %985 = vmatpush.bf16.msra.mxu0 %v3143_v55  ;;  %1073 = vmatpush.bf16.msrb.mxu1 %v3089_v61 }
  0x7b   :  { %1086 = vmatpush.bf16.msrb.mxu2 %v3091_v62 }
  0x7e   :  { %1074 = vmatpush.bf16.msrb.mxu1 %v3100_v7 }
  0x7f   :  { %1087 = vmatpush.bf16.msrb.mxu2 %v3103_v11 }
  0x80   :  { %648 = vmatmul.bf16.gmra.mxu0 %v3015_v34 }
  0x81   :  { %677 = vmatmul.bf16.gmra.mxu1 %v3017_v39 }
  0x82   :  { %706 = vmatmul.bf16.gmra.mxu2 %v3015_v34  ;;  %v3150_v34 = vor.u32 %v2682_v0, %v2313_v1  ;;  %1075 = vmatpush.bf16.msrb.mxu1 %v3117_v24 }
  0x83   :  { %735 = vmatmul.bf16.gmra.mxu3 %v3017_v39  ;;  %v2679_v39 = vld [vmem:[#allocation5 + $0xc] sm:$0xf0]  ;;  %1088 = vmatpush.bf16.msrb.mxu2 %v3119_v25 }
  0x84   :  { %v3154_v8 = vor.u32 %v2679_v39, %v2287_v3  ;;  %1024 = vmatpush.bf16.msra.mxu3 %v3150_v34 }
  0x86   :  { %986 = vmatpush.bf16.msra.mxu0 %v3154_v8  ;;  %1076 = vmatpush.bf16.msrb.mxu1 %v3128_v36 }
  0x87   :  { %1089 = vmatpush.bf16.msrb.mxu2 %v3131_v45 }
  0x88   :  { %1025 = vmatpush.bf16.msra.mxu3 %v3167_v20 }
  0x8a   :  { %1058 = vmatpush.bf16.msrb.mxu0 %v3043_v23  ;;  %1077 = vmatpush.bf16.msrb.mxu1 %v3145_v60 }
  0x8b   :  { %1090 = vmatpush.bf16.msrb.mxu2 %v3147_v63 }
  0x8c   :  { %1097 = vmatpush.bf16.msrb.mxu3 %v3050_v32 }
  0x8e   :  { %1059 = vmatpush.bf16.msrb.mxu0 %v3054_v37  ;;  %1078 = vmatpush.bf16.msrb.mxu1 %v3156_v9 }
  0x8f   :  { %1091 = vmatpush.bf16.msrb.mxu2 %v3159_v14 }
  0x90   :  { %653 = vmatmul.bf16.gmra.mxu0 %v3035_v18  ;;  %1098 = vmatpush.bf16.msrb.mxu3 %v3061_v46 }
  0x91   :  { %682 = vmatmul.bf16.gmra.mxu1 %v3037_v19 }
  0x92   :  { %711 = vmatmul.bf16.gmra.mxu2 %v3035_v18  ;;  %1060 = vmatpush.bf16.msrb.mxu0 %v3087_v57  ;;  %v3204_v18 = vld [vmem:[%s3708_s2] sm:$0xf] }
  0x93   :  { %740 = vmatmul.bf16.gmra.mxu3 %v3037_v19  ;;  %v3210_v19 = vperm.slane %v3204_v18, 0  ;;  %v3219_v29 = vperm.slane %v3204_v18, 1 }
  0x94   :  { %1099 = vmatpush.bf16.msrb.mxu3 %v3094_v2 }
  0x96   :  { %1061 = vmatpush.bf16.msrb.mxu0 %v3098_v6 }
  0x98   :  { %1100 = vmatpush.bf16.msrb.mxu3 %v3105_v13 }
  0x9a   :  { %1062 = vmatpush.bf16.msrb.mxu0 %v3115_v17 }
  0x9c   :  { %1101 = vmatpush.bf16.msrb.mxu3 %v3122_v44 }
  0x9e   :  { %1063 = vmatpush.bf16.msrb.mxu0 %v3126_v35 }
  0xa0   :  { %658 = vmatmul.bf16.gmra.mxu0 %v3079_v52  ;;  %1102 = vmatpush.bf16.msrb.mxu3 %v3133_v48 }
  0xa1   :  { %687 = vmatmul.bf16.gmra.mxu1 %v3081_v53 }
  0xa2   :  { %716 = vmatmul.bf16.gmra.mxu2 %v3079_v52  ;;  %1064 = vmatpush.bf16.msrb.mxu0 %v3143_v55 }
  0xa3   :  { %745 = vmatmul.bf16.gmra.mxu3 %v3081_v53 }
  0xa4   :  { %1103 = vmatpush.bf16.msrb.mxu3 %v3150_v34 }
  0xa6   :  { %1065 = vmatpush.bf16.msrb.mxu0 %v3154_v8 }
  0xa8   :  { %1104 = vmatpush.bf16.msrb.mxu3 %v3167_v20 }
  0xad   :  { %v528_v52 = vpop.f32.mrf.mxu0 }
  0xae   :  { %v529_v53 = vadd.f32 %v528_v52, %v3210_v19  ;;  %v557_v21 = vpop.f32.mrf.mxu1 }
  0xb0   :  { %v3216_v22 = vadd.f32 %v557_v21, %v529_v53  ;;  %987 = vmatmul.bf16.vlgmr.msra.gmra.mxu0 %v2928_v26 }
  0xb1   :  { %1000 = vmatmul.bf16.vlgmr.msra.gmra.mxu1 %v2928_v26  ;;  %1137 = vmatpush.bf16.msra.mxu0 %v3043_v23 }
  0xb2   :  { %1013 = vmatmul.bf16.vlgmr.msra.gmra.mxu2 %v2928_v26  ;;  %1150 = vmatpush.bf16.msra.mxu1 %v3045_v27 }
  0xb3   :  { %1026 = vmatmul.bf16.vlgmr.msra.gmra.mxu3 %v2928_v26  ;;  %1163 = vmatpush.bf16.msra.mxu2 %v3047_v28 }
  0xb4   :  { %1176 = vmatpush.bf16.msra.mxu3 %v3050_v32 }
  0xb5   :  { %v586_v30 = vpop.f32.mrf.mxu2  ;;  %v3226_v33 = vpop.f32.mrf.mxu0  ;;  %1138 = vmatpush.bf16.msra.mxu0 %v3054_v37 }
  0xb6   :  { %v587_v49 = vadd.f32 %v586_v30, %v3219_v29  ;;  %v615_v31 = vpop.f32.mrf.mxu3  ;;  %v3228_v40 = vpop.f32.mrf.mxu1  ;;  %1151 = vmatpush.bf16.msra.mxu1 %v3056_v38 }
  0xb7   :  { %1164 = vmatpush.bf16.msra.mxu2 %v3059_v43 }
  0xb8   :  { %v3231_v41 = vadd.f32 %v615_v31, %v587_v49  ;;  %1177 = vmatpush.bf16.msra.mxu3 %v3061_v46 }
  0xb9   :  { %1139 = vmatpush.bf16.msra.mxu0 %v3087_v57 }
  0xba   :  { %1152 = vmatpush.bf16.msra.mxu1 %v3089_v61 }
  0xbb   :  { %1165 = vmatpush.bf16.msra.mxu2 %v3091_v62 }
  0xbc   :  { %1178 = vmatpush.bf16.msra.mxu3 %v3094_v2 }
  0xbd   :  { %v3239_v42 = vpop.f32.mrf.mxu2  ;;  %v533_v50 = vpop.f32.mrf.mxu0  ;;  %1140 = vmatpush.bf16.msra.mxu0 %v3098_v6 }
  0xbe   :  { %v3242_v47 = vpop.f32.mrf.mxu3  ;;  %v534_v51 = vadd.f32 %v533_v50, %v3210_v19  ;;  %v562_v54 = vpop.f32.mrf.mxu1  ;;  %1153 = vmatpush.bf16.msra.mxu1 %v3100_v7 }
  0xbf   :  { %1166 = vmatpush.bf16.msra.mxu2 %v3103_v11 }
  0xc0   :  { %v3248_v56 = vadd.f32 %v562_v54, %v534_v51  ;;  %1179 = vmatpush.bf16.msra.mxu3 %v3105_v13 }
  0xc1   :  { %1141 = vmatpush.bf16.msra.mxu0 %v3115_v17 }
  0xc2   :  { %3715 = vst [vmem:[#allocation10_spill] sm:$0xff] %v3248_v56  ;;  %1154 = vmatpush.bf16.msra.mxu1 %v3117_v24 }
  0xc3   :  { %1167 = vmatpush.bf16.msra.mxu2 %v3119_v25 }
  0xc4   :  { %1180 = vmatpush.bf16.msra.mxu3 %v3122_v44 }
  0xc5   :  { %v591_v58 = vpop.f32.mrf.mxu2  ;;  %v3256_v1 = vpop.f32.mrf.mxu0  ;;  %1142 = vmatpush.bf16.msra.mxu0 %v3126_v35 }
  0xc6   :  { %v592_v59 = vadd.f32 %v591_v58, %v3219_v29  ;;  %v620_v0 = vpop.f32.mrf.mxu3  ;;  %3716 = vst [vmem:[#allocation11_spill] sm:$0xff] %v3256_v1  ;;  %v3258_v3 = vpop.f32.mrf.mxu1  ;;  %1155 = vmatpush.bf16.msra.mxu1 %v3128_v36 }
  0xc7   :  { %3717 = vst [vmem:[#allocation12_spill] sm:$0xff] %v3258_v3  ;;  %1168 = vmatpush.bf16.msra.mxu2 %v3131_v45 }
  0xc8   :  { %v3261_v39 = vadd.f32 %v620_v0, %v592_v59  ;;  %1181 = vmatpush.bf16.msra.mxu3 %v3133_v48 }
  0xc9   :  { %1143 = vmatpush.bf16.msra.mxu0 %v3143_v55 }
  0xca   :  { %3718 = vst [vmem:[#allocation13_spill] sm:$0xff] %v3261_v39  ;;  %1156 = vmatpush.bf16.msra.mxu1 %v3145_v60 }
  0xcb   :  { %1169 = vmatpush.bf16.msra.mxu2 %v3147_v63 }
  0xcc   :  { %1182 = vmatpush.bf16.msra.mxu3 %v3150_v34 }
  0xcd   :  { %v3269_v4 = vpop.f32.mrf.mxu2  ;;  %v538_v10 = vpop.f32.mrf.mxu0  ;;  %1144 = vmatpush.bf16.msra.mxu0 %v3154_v8 }
  0xce   :  { %3719 = vst [vmem:[#allocation14_spill] sm:$0xff] %v3269_v4  ;;  %v3272_v5 = vpop.f32.mrf.mxu3  ;;  %v539_v12 = vadd.f32 %v538_v10, %v3210_v19  ;;  %v567_v15 = vpop.f32.mrf.mxu1  ;;  %1157 = vmatpush.bf16.msra.mxu1 %v3156_v9 }
  0xcf   :  { %3720 = vst [vmem:[#allocation15_spill] sm:$0xff] %v3272_v5  ;;  %1170 = vmatpush.bf16.msra.mxu2 %v3159_v14 }
  0xd0   :  { %v3278_v16 = vadd.f32 %v567_v15, %v539_v12  ;;  %1183 = vmatpush.bf16.msra.mxu3 %v3167_v20 }
  0xd2   :  { %3721 = vst [vmem:[#allocation16_spill] sm:$0xff] %v3278_v16 }
  0xd5   :  { %v596_v52 = vpop.f32.mrf.mxu2  ;;  %v3282_v26 = vpop.f32.mrf.mxu0 }
  0xd6   :  { %v597_v53 = vadd.f32 %v596_v52, %v3219_v29  ;;  %v625_v21 = vpop.f32.mrf.mxu3  ;;  %3722 = vst [vmem:[#allocation17_spill] sm:$0xff] %v3282_v26  ;;  %v3284_v30 = vpop.f32.mrf.mxu1 }
  0xd7   :  { %3723 = vst [vmem:[#allocation18_spill] sm:$0xff] %v3284_v30 }
  0xd8   :  { %v3286_v49 = vadd.f32 %v625_v21, %v597_v53  ;;  %v3303_v21 = vperm.slane %v3204_v18, 2 }
  0xda   :  { %3724 = vst [vmem:[#allocation19_spill] sm:$0xff] %v3286_v49 }
  0xdd   :  { %v3288_v31 = vpop.f32.mrf.mxu2  ;;  %v543_v51 = vpop.f32.mrf.mxu0 }
  0xde   :  { %3725 = vst [vmem:[#allocation20_spill] sm:$0xff] %v3288_v31  ;;  %v3290_v50 = vpop.f32.mrf.mxu3  ;;  %v544_v54 = vadd.f32 %v543_v51, %v3210_v19  ;;  %v572_v58 = vpop.f32.mrf.mxu1 }
  0xdf   :  { %3726 = vst [vmem:[#allocation21_spill] sm:$0xff] %v3290_v50 }
  0xe0   :  { %v3293_v59 = vadd.f32 %v572_v58, %v544_v54 }
  0xe2   :  { %3727 = vst [vmem:[#allocation22_spill] sm:$0xff] %v3293_v59 }
  0xe5   :  { %v601_v0 = vpop.f32.mrf.mxu2  ;;  %v3296_v15 = vpop.f32.mrf.mxu0 }
  0xe6   :  { %v602_v10 = vadd.f32 %v601_v0, %v3219_v29  ;;  %v630_v12 = vpop.f32.mrf.mxu3  ;;  %3728 = vst [vmem:[#allocation23_spill] sm:$0xff] %v3296_v15  ;;  %v3298_v52 = vpop.f32.mrf.mxu1  ;;  %v3313_v0 = vperm.slane %v3204_v18, 3 }
  0xe7   :  { %3729 = vst [vmem:[#allocation24_spill] sm:$0xff] %v3298_v52 }
  0xe8   :  { %v3300_v53 = vadd.f32 %v630_v12, %v602_v10 }
  0xea   :  { %3730 = vst [vmem:[#allocation25_spill] sm:$0xff] %v3300_v53 }
  0xed   :  { %v3305_v50 = vpop.f32.mrf.mxu2  ;;  %v644_v51 = vpop.f32.mrf.mxu0 }
  0xee   :  { %3731 = vst [vmem:[#allocation26_spill] sm:$0xff] %v3305_v50  ;;  %v3307_v30 = vpop.f32.mrf.mxu3  ;;  %v645_v54 = vadd.f32 %v644_v51, %v3303_v21  ;;  %v673_v58 = vpop.f32.mrf.mxu1 }
  0xef   :  { %3732 = vst [vmem:[#allocation27_spill] sm:$0xff] %v3307_v30 }
  0xf0   :  { %v3310_v59 = vadd.f32 %v673_v58, %v645_v54 }
  0xf5   :  { %v702_v15 = vpop.f32.mrf.mxu2  ;;  %v3316_v52 = vpop.f32.mrf.mxu0 }
  0xf6   :  { %v703_v10 = vadd.f32 %v702_v15, %v3313_v0  ;;  %v731_v12 = vpop.f32.mrf.mxu3  ;;  %v3318_v53 = vpop.f32.mrf.mxu1 }
  0xf8   :  { %v732_v50 = vadd.f32 %v731_v12, %v703_v10 }
  0xfd   :  { %v3320_v31 = vpop.f32.mrf.mxu2  ;;  %v649_v51 = vpop.f32.mrf.mxu0 }
  0xfe   :  { %v3322_v30 = vpop.f32.mrf.mxu3  ;;  %v650_v54 = vadd.f32 %v649_v51, %v3303_v21  ;;  %v678_v58 = vpop.f32.mrf.mxu1 }
  0xff   :  { %3733 = vst [vmem:[#allocation28_spill] sm:$0xff] %v3322_v30 }
 0x100   :  { %v3325_v26 = vadd.f32 %v678_v58, %v650_v54 }
 0x102   :  { %3734 = vst [vmem:[#allocation29_spill] sm:$0xff] %v3325_v26 }
 0x105   :  { %v707_v18 = vpop.f32.mrf.mxu2  ;;  %v3328_v16 = vpop.f32.mrf.mxu0 }
 0x106   :  { %v708_v49 = vadd.f32 %v707_v18, %v3313_v0  ;;  %v736_v15 = vpop.f32.mrf.mxu3  ;;  %3735 = vst [vmem:[#allocation30_spill] sm:$0xff] %v3328_v16  ;;  %v3330_v5 = vpop.f32.mrf.mxu1 }
 0x107   :  { %3736 = vst [vmem:[#allocation31_spill] sm:$0xff] %v3330_v5 }
 0x108   :  { %v3332_v3 = vadd.f32 %v736_v15, %v708_v49 }
 0x10a   :  { %3737 = vst [vmem:[#allocation32_spill] sm:$0xff] %v3332_v3 }
 0x10d   :  { %v709_v10 = vpop.f32.mrf.mxu2  ;;  %v654_v1 = vpop.f32.mrf.mxu0 }
 0x10e   :  { %v710_v12 = vadd.f32 %v709_v10, %v3313_v0  ;;  %v738_v4 = vpop.f32.mrf.mxu3  ;;  %v655_v51 = vadd.f32 %v654_v1, %v3303_v21  ;;  %v683_v39 = vpop.f32.mrf.mxu1 }
 0x110   :  { %v3336_v54 = vadd.f32 %v738_v4, %v710_v12  ;;  %v3338_v58 = vadd.f32 %v683_v39, %v655_v51 }
 0x112   :  { %3738 = vst [vmem:[#allocation33_spill] sm:$0xff] %v3336_v54 }
 0x113   :  { %3739 = vst [vmem:[#allocation34_spill] sm:$0xff] %v3338_v58 }
 0x115   :  { %v712_v18 = vpop.f32.mrf.mxu2  ;;  %v656_v56 = vpop.f32.mrf.mxu0 }
 0x116   :  { %v713_v26 = vadd.f32 %v712_v18, %v3313_v0  ;;  %v741_v16 = vpop.f32.mrf.mxu3  ;;  %v657_v49 = vadd.f32 %v656_v56, %v3303_v21  ;;  %v685_v15 = vpop.f32.mrf.mxu1 }
 0x118   :  { %v3342_v5 = vadd.f32 %v741_v16, %v713_v26  ;;  %v3344_v10 = vadd.f32 %v685_v15, %v657_v49 }
 0x11a   :  { %3740 = vst [vmem:[#allocation35_spill] sm:$0xff] %v3342_v5 }
 0x11b   :  { %3741 = vst [vmem:[#allocation36_spill] sm:$0xff] %v3344_v10 }
 0x11d   :  { %v714_v3 = vpop.f32.mrf.mxu2  ;;  %v659_v4 = vpop.f32.mrf.mxu0 }
 0x11e   :  { %v715_v1 = vadd.f32 %v714_v3, %v3313_v0  ;;  %v743_v30 = vpop.f32.mrf.mxu3  ;;  %v660_v39 = vadd.f32 %v659_v4, %v3303_v21  ;;  %v688_v12 = vpop.f32.mrf.mxu1 }
 0x120   :  { %v3348_v51 = vadd.f32 %v743_v30, %v715_v1  ;;  %v3350_v18 = vadd.f32 %v688_v12, %v660_v39 }
 0x122   :  { %3742 = vst [vmem:[#allocation37_spill] sm:$0xff] %v3348_v51 }
 0x123   :  { %3743 = vst [vmem:[#allocation38_spill] sm:$0xff] %v3350_v18 }
 0x125   :  { %v717_v58 = vpop.f32.mrf.mxu2  ;;  %v661_v16 = vpop.f32.mrf.mxu0 }
 0x126   :  { %v718_v56 = vadd.f32 %v717_v58, %v3313_v0  ;;  %v746_v54 = vpop.f32.mrf.mxu3  ;;  %v662_v26 = vadd.f32 %v661_v16, %v3303_v21  ;;  %v690_v49 = vpop.f32.mrf.mxu1 }
 0x128   :  { %v3354_v15 = vadd.f32 %v746_v54, %v718_v56  ;;  %v3356_v3 = vadd.f32 %v690_v49, %v662_v26 }
 0x12a   :  { %3744 = vst [vmem:[#allocation39_spill] sm:$0xff] %v3354_v15 }
 0x12b   :  { %3745 = vst [vmem:[#allocation40_spill] sm:$0xff] %v3356_v3 }
 0x12d   :  { %v719_v10 = vpop.f32.mrf.mxu2  ;;  %v988_v30 = vpop.f32.mrf.mxu0 }
 0x12e   :  { %v720_v4 = vadd.f32 %v719_v10, %v3313_v0  ;;  %v748_v5 = vpop.f32.mrf.mxu3  ;;  %v1031_v1 = vadd.f32 %v988_v30, %v3216_v22  ;;  %v1001_v39 = vpop.f32.mrf.mxu1 }
 0x12f   :  { %v1032_v58 = vadd.f32 %v1001_v39, %v3231_v41 }
 0x130   :  { %v3360_v12 = vadd.f32 %v748_v5, %v720_v4  ;;  %v1035_v18 = vmul.f32 0.5, %v1031_v1 }
 0x131   :  { %v1039_v51 = vmul.f32 0.5, %v1032_v58 }
 0x132   :  { %3746 = vst [vmem:[#allocation41_spill] sm:$0xff] %v3360_v12  ;;  %2765 = vtanh.f32 %v1035_v18 }
 0x133   :  { %2767 = vtanh.f32 %v1039_v51 }
 0x135   :  { %v1014_v54 = vpop.f32.mrf.mxu2  ;;  %v990_v26 = vpop.f32.mrf.mxu0 }
 0x136   :  { %v1033_v56 = vadd.f32 %v1014_v54, %v3310_v59  ;;  %v1027_v16 = vpop.f32.mrf.mxu3  ;;  %v1003_v10 = vpop.f32.mrf.mxu1 }
 0x137   :  { %v1034_v49 = vadd.f32 %v1027_v16, %v732_v50 }
 0x138   :  { %2769 = vtanh.f32 %v1033_v56  ;;  %v2766_v3 = vpop.eup %2765 }
 0x139   :  { %v1044_v15 = vmul.f32 0.5, %v1034_v49  ;;  %v2768_v22 = vpop.eup %2767  ;;  %v1037_v30 = vmul.f32 0.5, %v2766_v3  ;;  %v589_v3 = vadd.f32 %v3239_v42, %v3219_v29  ;;  %v3747_v42 = vld [vmem:[#allocation28_spill] sm:$0xff] }
 0x13a   :  { %v1041_v5 = vmul.f32 0.5, %v2768_v22 }
 0x13b   :  { %2771 = vtanh.f32 %v1044_v15  ;;  %v1038_v4 = vadd.f32 0.5, %v1037_v30  ;;  %v531_v15 = vadd.f32 %v3226_v33, %v3210_v19  ;;  %v618_v49 = vadd.f32 %v3242_v47, %v589_v3 }
 0x13c   :  { %v1042_v41 = vadd.f32 0.5, %v1041_v5 }
 0x13d   :  { %v1016_v1 = vpop.f32.mrf.mxu2 }
 0x13e   :  { %v2770_v39 = vpop.eup %2769  ;;  %v1029_v18 = vpop.f32.mrf.mxu3  ;;  %v1048_v51 = vmul.f32 0.0, %v1042_v41  ;;  %v705_v41 = vadd.f32 %v3320_v31, %v3313_v0 }
 0x13f   :  { %v1049_v58 = vmul.f32 %v2770_v39, %v1038_v4  ;;  %v647_v4 = vadd.f32 %v3316_v52, %v3303_v21 }
 0x140   :  { %v734_v18 = vadd.f32 %v3747_v42, %v705_v41  ;;  %v3748_v42 = vld [vmem:[#allocation10_spill] sm:$0xff] }
 0x141   :  { %v2772_v12 = vpop.eup %2771  ;;  %v3364_v59 = vadd.f32 %v1049_v58, %v1048_v51  ;;  %v676_v33 = vadd.f32 %v3318_v53, %v647_v4 }
 0x142   :  { %v1046_v50 = vmul.f32 0.5, %v2772_v12  ;;  %v560_v12 = vadd.f32 %v3228_v40, %v531_v15 }
 0x143   :  { %2773 = vtanh.f32 %v3364_v59 }
 0x144   :  { %v1047_v54 = vadd.f32 0.5, %v1046_v50 }
 0x149   :  { %v2774_v56 = vpop.eup %2773 }
 0x14a   :  { %v1052_v16 = vmul.f32 %v2774_v56, %v1047_v54 }
 0x14c   :  { %v1057_v26 = vpack.c.bf16 %v1052_v16, %v1052_v16 }
 0x14e   :  { %1066 = vmatmul.bf16.vlgmr.msrb.gmra.mxu0 %v1057_v26  ;;  %1079 = vmatmul.bf16.vlgmr.msrb.gmra.mxu1 %v1057_v26 }
 0x14f   :  { %1092 = vmatmul.bf16.vlgmr.msrb.gmra.mxu2 %v1057_v26  ;;  %1105 = vmatmul.bf16.vlgmr.msrb.gmra.mxu3 %v1057_v26 }
 0x150   :  { %1216 = vmatpush.bf16.msrb.mxu0 %v3043_v23  ;;  %1229 = vmatpush.bf16.msrb.mxu1 %v3045_v27 }
 0x151   :  { %1242 = vmatpush.bf16.msrb.mxu2 %v3047_v28  ;;  %1255 = vmatpush.bf16.msrb.mxu3 %v3050_v32 }
 0x154   :  { %1217 = vmatpush.bf16.msrb.mxu0 %v3054_v37  ;;  %1230 = vmatpush.bf16.msrb.mxu1 %v3056_v38 }
 0x155   :  { %1243 = vmatpush.bf16.msrb.mxu2 %v3059_v43  ;;  %1256 = vmatpush.bf16.msrb.mxu3 %v3061_v46 }
 0x158   :  { %1218 = vmatpush.bf16.msrb.mxu0 %v3087_v57  ;;  %1231 = vmatpush.bf16.msrb.mxu1 %v3089_v61 }
 0x159   :  { %1244 = vmatpush.bf16.msrb.mxu2 %v3091_v62  ;;  %1257 = vmatpush.bf16.msrb.mxu3 %v3094_v2 }
 0x15c   :  { %1219 = vmatpush.bf16.msrb.mxu0 %v3098_v6  ;;  %1232 = vmatpush.bf16.msrb.mxu1 %v3100_v7 }
 0x15d   :  { %1245 = vmatpush.bf16.msrb.mxu2 %v3103_v11  ;;  %1258 = vmatpush.bf16.msrb.mxu3 %v3105_v13 }
 0x160   :  { %1220 = vmatpush.bf16.msrb.mxu0 %v3115_v17  ;;  %1233 = vmatpush.bf16.msrb.mxu1 %v3117_v24 }
 0x161   :  { %1246 = vmatpush.bf16.msrb.mxu2 %v3119_v25  ;;  %1259 = vmatpush.bf16.msrb.mxu3 %v3122_v44 }
 0x164   :  { %1221 = vmatpush.bf16.msrb.mxu0 %v3126_v35  ;;  %1234 = vmatpush.bf16.msrb.mxu1 %v3128_v36 }
 0x165   :  { %1247 = vmatpush.bf16.msrb.mxu2 %v3131_v45  ;;  %1260 = vmatpush.bf16.msrb.mxu3 %v3133_v48 }
 0x168   :  { %1222 = vmatpush.bf16.msrb.mxu0 %v3143_v55  ;;  %1235 = vmatpush.bf16.msrb.mxu1 %v3145_v60 }
 0x169   :  { %1248 = vmatpush.bf16.msrb.mxu2 %v3147_v63  ;;  %1261 = vmatpush.bf16.msrb.mxu3 %v3150_v34 }
 0x16c   :  { %1223 = vmatpush.bf16.msrb.mxu0 %v3154_v8  ;;  %1236 = vmatpush.bf16.msrb.mxu1 %v3156_v9 }
 0x16d   :  { %1249 = vmatpush.bf16.msrb.mxu2 %v3159_v14  ;;  %1262 = vmatpush.bf16.msrb.mxu3 %v3167_v20 }
 0x1cb   :  { %v1067_v10 = vpop.f32.mrf.mxu0  ;;  %v1080_v22 = vpop.f32.mrf.mxu1 }
 0x1cc   :  { %v1110_v30 = vadd.f32 %v1067_v10, %v560_v12  ;;  %v1111_v5 = vadd.f32 %v1080_v22, %v618_v49 }
 0x1ce   :  { %v1114_v1 = vmul.f32 0.5, %v1110_v30  ;;  %v1118_v39 = vmul.f32 0.5, %v1111_v5 }
 0x1d0   :  { %2775 = vtanh.f32 %v1114_v1 }
 0x1d1   :  { %2777 = vtanh.f32 %v1118_v39 }
 0x1d2   :  { %v1093_v40 = vpop.f32.mrf.mxu2  ;;  %v1106_v47 = vpop.f32.mrf.mxu3 }
 0x1d3   :  { %v1112_v51 = vadd.f32 %v1093_v40, %v676_v33  ;;  %v1113_v58 = vadd.f32 %v1106_v47, %v734_v18  ;;  %v1069_v50 = vpop.f32.mrf.mxu0  ;;  %v1082_v54 = vpop.f32.mrf.mxu1  ;;  %v3749_v40 = vld [vmem:[#allocation13_spill] sm:$0xff] }
 0x1d5   :  { %2779 = vtanh.f32 %v1112_v51  ;;  %v1123_v56 = vmul.f32 0.5, %v1113_v58 }
 0x1d6   :  { %v2776_v52 = vpop.eup %2775 }
 0x1d7   :  { %v2778_v16 = vpop.eup %2777  ;;  %v1116_v26 = vmul.f32 0.5, %v2776_v52  ;;  %2781 = vtanh.f32 %v1123_v56  ;;  %v3750_v56 = vld [vmem:[#allocation29_spill] sm:$0xff] }
 0x1d8   :  { %v1120_v31 = vmul.f32 0.5, %v2778_v16  ;;  %v3751_v16 = vld [vmem:[#allocation32_spill] sm:$0xff] }
 0x1d9   :  { %v1117_v0 = vadd.f32 0.5, %v1116_v26 }
 0x1da   :  { %v1121_v15 = vadd.f32 0.5, %v1120_v31  ;;  %v1095_v3 = vpop.f32.mrf.mxu2  ;;  %v1108_v53 = vpop.f32.mrf.mxu3 }
 0x1db   :  { %v2780_v12 = vpop.eup %2779 }
 0x1dc   :  { %v1127_v49 = vmul.f32 %v1121_v15, %v3364_v59  ;;  %v1128_v10 = vmul.f32 %v2780_v12, %v1117_v0 }
 0x1dd   :  { %v2782_v22 = vpop.eup %2781 }
 0x1de   :  { %v3412_v30 = vadd.f32 %v1128_v10, %v1127_v49  ;;  %v1125_v5 = vmul.f32 0.5, %v2782_v22 }
 0x1e0   :  { %2783 = vtanh.f32 %v3412_v30  ;;  %v1126_v4 = vadd.f32 0.5, %v1125_v5 }
 0x1e6   :  { %v2784_v41 = vpop.eup %2783 }
 0x1e7   :  { %v1131_v1 = vmul.f32 %v2784_v41, %v1126_v4 }
 0x1e9   :  { %v1136_v39 = vpack.c.bf16 %v1131_v1, %v1131_v1 }
 0x1eb   :  { %1145 = vmatmul.bf16.vlgmr.msra.gmra.mxu0 %v1136_v39  ;;  %1158 = vmatmul.bf16.vlgmr.msra.gmra.mxu1 %v1136_v39 }
 0x1ec   :  { %1171 = vmatmul.bf16.vlgmr.msra.gmra.mxu2 %v1136_v39  ;;  %1184 = vmatmul.bf16.vlgmr.msra.gmra.mxu3 %v1136_v39 }
 0x1ed   :  { %1295 = vmatpush.bf16.msra.mxu0 %v3043_v23  ;;  %1308 = vmatpush.bf16.msra.mxu1 %v3045_v27 }
 0x1ee   :  { %1321 = vmatpush.bf16.msra.mxu2 %v3047_v28  ;;  %1334 = vmatpush.bf16.msra.mxu3 %v3050_v32 }
 0x1f1   :  { %1296 = vmatpush.bf16.msra.mxu0 %v3054_v37  ;;  %1309 = vmatpush.bf16.msra.mxu1 %v3056_v38 }
 0x1f2   :  { %1322 = vmatpush.bf16.msra.mxu2 %v3059_v43  ;;  %1335 = vmatpush.bf16.msra.mxu3 %v3061_v46 }
 0x1f5   :  { %1297 = vmatpush.bf16.msra.mxu0 %v3087_v57  ;;  %1310 = vmatpush.bf16.msra.mxu1 %v3089_v61 }
 0x1f6   :  { %1323 = vmatpush.bf16.msra.mxu2 %v3091_v62  ;;  %1336 = vmatpush.bf16.msra.mxu3 %v3094_v2 }
 0x1f9   :  { %1298 = vmatpush.bf16.msra.mxu0 %v3098_v6  ;;  %1311 = vmatpush.bf16.msra.mxu1 %v3100_v7 }
 0x1fa   :  { %1324 = vmatpush.bf16.msra.mxu2 %v3103_v11  ;;  %1337 = vmatpush.bf16.msra.mxu3 %v3105_v13 }
 0x1fd   :  { %1299 = vmatpush.bf16.msra.mxu0 %v3115_v17  ;;  %1312 = vmatpush.bf16.msra.mxu1 %v3117_v24 }
 0x1fe   :  { %1325 = vmatpush.bf16.msra.mxu2 %v3119_v25  ;;  %1338 = vmatpush.bf16.msra.mxu3 %v3122_v44 }
 0x201   :  { %1300 = vmatpush.bf16.msra.mxu0 %v3126_v35  ;;  %1313 = vmatpush.bf16.msra.mxu1 %v3128_v36 }
 0x202   :  { %1326 = vmatpush.bf16.msra.mxu2 %v3131_v45  ;;  %1339 = vmatpush.bf16.msra.mxu3 %v3133_v48 }
 0x205   :  { %1301 = vmatpush.bf16.msra.mxu0 %v3143_v55  ;;  %1314 = vmatpush.bf16.msra.mxu1 %v3145_v60 }
 0x206   :  { %1327 = vmatpush.bf16.msra.mxu2 %v3147_v63  ;;  %1340 = vmatpush.bf16.msra.mxu3 %v3150_v34 }
 0x209   :  { %1302 = vmatpush.bf16.msra.mxu0 %v3154_v8  ;;  %1315 = vmatpush.bf16.msra.mxu1 %v3156_v9 }
 0x20a   :  { %1328 = vmatpush.bf16.msra.mxu2 %v3159_v14  ;;  %1341 = vmatpush.bf16.msra.mxu3 %v3167_v20 }
 0x268   :  { %v1146_v59 = vpop.f32.mrf.mxu0  ;;  %v1159_v33 = vpop.f32.mrf.mxu1 }
 0x269   :  { %v1189_v18 = vadd.f32 %v1146_v59, %v3748_v42  ;;  %v1190_v47 = vadd.f32 %v1159_v33, %v3749_v40 }
 0x26b   :  { %v1193_v51 = vmul.f32 0.5, %v1189_v18  ;;  %v1197_v58 = vmul.f32 0.5, %v1190_v47 }
 0x26d   :  { %2785 = vtanh.f32 %v1193_v51 }
 0x26e   :  { %2787 = vtanh.f32 %v1197_v58 }
 0x26f   :  { %v1172_v50 = vpop.f32.mrf.mxu2  ;;  %v1185_v54 = vpop.f32.mrf.mxu3 }
 0x270   :  { %v1191_v52 = vadd.f32 %v1172_v50, %v3750_v56  ;;  %v1192_v26 = vadd.f32 %v1185_v54, %v3751_v16  ;;  %v1148_v31 = vpop.f32.mrf.mxu0  ;;  %v1161_v0 = vpop.f32.mrf.mxu1  ;;  %v3753_v50 = vld [vmem:[#allocation14_spill] sm:$0xff]  ;;  %v3754_v56 = vld [vmem:[#allocation12_spill] sm:$0xff]  ;;  %v3755_v16 = vld [vmem:[#allocation15_spill] sm:$0xff] }
 0x271   :  { %v594_v54 = vadd.f32 %v3753_v50, %v3219_v29 }
 0x272   :  { %2789 = vtanh.f32 %v1191_v52  ;;  %v1202_v15 = vmul.f32 0.5, %v1192_v26 }
 0x273   :  { %v2786_v3 = vpop.eup %2785  ;;  %v623_v26 = vadd.f32 %v3755_v16, %v594_v54 }
 0x274   :  { %v2788_v53 = vpop.eup %2787  ;;  %v1195_v12 = vmul.f32 0.5, %v2786_v3  ;;  %2791 = vtanh.f32 %v1202_v15 }
 0x275   :  { %v1199_v49 = vmul.f32 0.5, %v2788_v53  ;;  %v3756_v53 = vld [vmem:[#allocation30_spill] sm:$0xff] }
 0x276   :  { %v1196_v10 = vadd.f32 0.5, %v1195_v12  ;;  %v652_v12 = vadd.f32 %v3756_v53, %v3303_v21 }
 0x277   :  { %v1200_v22 = vadd.f32 0.5, %v1199_v49  ;;  %v1174_v5 = vpop.f32.mrf.mxu2  ;;  %v1187_v4 = vpop.f32.mrf.mxu3 }
 0x278   :  { %v2790_v41 = vpop.eup %2789 }
 0x279   :  { %v1206_v1 = vmul.f32 %v1200_v22, %v3412_v30  ;;  %v1207_v39 = vmul.f32 %v2790_v41, %v1196_v10  ;;  %v3752_v30 = vld [vmem:[#allocation11_spill] sm:$0xff] }
 0x27a   :  { %v2792_v59 = vpop.eup %2791  ;;  %v536_v58 = vadd.f32 %v3752_v30, %v3210_v19  ;;  %v3757_v22 = vld [vmem:[#allocation31_spill] sm:$0xff] }
 0x27b   :  { %v3452_v33 = vadd.f32 %v1207_v39, %v1206_v1  ;;  %v1204_v42 = vmul.f32 0.5, %v2792_v59  ;;  %v681_v5 = vadd.f32 %v3757_v22, %v652_v12  ;;  %v3758_v39 = vld [vmem:[#allocation33_spill] sm:$0xff]  ;;  %v3759_v22 = vld [vmem:[#allocation16_spill] sm:$0xff] }
 0x27c   :  { %v565_v52 = vadd.f32 %v3754_v56, %v536_v58 }
 0x27d   :  { %2793 = vtanh.f32 %v3452_v33  ;;  %v1205_v18 = vadd.f32 0.5, %v1204_v42 }
 0x283   :  { %v2794_v40 = vpop.eup %2793 }
 0x284   :  { %v1210_v47 = vmul.f32 %v2794_v40, %v1205_v18 }
 0x286   :  { %v1215_v51 = vpack.c.bf16 %v1210_v47, %v1210_v47 }
 0x288   :  { %1224 = vmatmul.bf16.vlgmr.msrb.gmra.mxu0 %v1215_v51  ;;  %1237 = vmatmul.bf16.vlgmr.msrb.gmra.mxu1 %v1215_v51 }
 0x289   :  { %1250 = vmatmul.bf16.vlgmr.msrb.gmra.mxu2 %v1215_v51  ;;  %1263 = vmatmul.bf16.vlgmr.msrb.gmra.mxu3 %v1215_v51 }
 0x28a   :  { %1374 = vmatpush.bf16.msrb.mxu0 %v3043_v23  ;;  %1387 = vmatpush.bf16.msrb.mxu1 %v3045_v27 }
 0x28b   :  { %1400 = vmatpush.bf16.msrb.mxu2 %v3047_v28  ;;  %1413 = vmatpush.bf16.msrb.mxu3 %v3050_v32 }
 0x28e   :  { %1375 = vmatpush.bf16.msrb.mxu0 %v3054_v37  ;;  %1388 = vmatpush.bf16.msrb.mxu1 %v3056_v38 }
 0x28f   :  { %1401 = vmatpush.bf16.msrb.mxu2 %v3059_v43  ;;  %1414 = vmatpush.bf16.msrb.mxu3 %v3061_v46 }
 0x292   :  { %1376 = vmatpush.bf16.msrb.mxu0 %v3087_v57  ;;  %1389 = vmatpush.bf16.msrb.mxu1 %v3089_v61 }
 0x293   :  { %1402 = vmatpush.bf16.msrb.mxu2 %v3091_v62  ;;  %1415 = vmatpush.bf16.msrb.mxu3 %v3094_v2 }
 0x296   :  { %1377 = vmatpush.bf16.msrb.mxu0 %v3098_v6  ;;  %1390 = vmatpush.bf16.msrb.mxu1 %v3100_v7 }
 0x297   :  { %1403 = vmatpush.bf16.msrb.mxu2 %v3103_v11  ;;  %1416 = vmatpush.bf16.msrb.mxu3 %v3105_v13 }
 0x29a   :  { %1378 = vmatpush.bf16.msrb.mxu0 %v3115_v17  ;;  %1391 = vmatpush.bf16.msrb.mxu1 %v3117_v24 }
 0x29b   :  { %1404 = vmatpush.bf16.msrb.mxu2 %v3119_v25  ;;  %1417 = vmatpush.bf16.msrb.mxu3 %v3122_v44 }
 0x29e   :  { %1379 = vmatpush.bf16.msrb.mxu0 %v3126_v35  ;;  %1392 = vmatpush.bf16.msrb.mxu1 %v3128_v36 }
 0x29f   :  { %1405 = vmatpush.bf16.msrb.mxu2 %v3131_v45  ;;  %1418 = vmatpush.bf16.msrb.mxu3 %v3133_v48 }
 0x2a2   :  { %1380 = vmatpush.bf16.msrb.mxu0 %v3143_v55  ;;  %1393 = vmatpush.bf16.msrb.mxu1 %v3145_v60 }
 0x2a3   :  { %1406 = vmatpush.bf16.msrb.mxu2 %v3147_v63  ;;  %1419 = vmatpush.bf16.msrb.mxu3 %v3150_v34 }
 0x2a6   :  { %1381 = vmatpush.bf16.msrb.mxu0 %v3154_v8  ;;  %1394 = vmatpush.bf16.msrb.mxu1 %v3156_v9 }
 0x2a7   :  { %1407 = vmatpush.bf16.msrb.mxu2 %v3159_v14  ;;  %1420 = vmatpush.bf16.msrb.mxu3 %v3167_v20 }
 0x305   :  { %v1225_v31 = vpop.f32.mrf.mxu0  ;;  %v1238_v0 = vpop.f32.mrf.mxu1 }
 0x306   :  { %v1268_v15 = vadd.f32 %v1225_v31, %v565_v52  ;;  %v1269_v3 = vadd.f32 %v1238_v0, %v623_v26 }
 0x308   :  { %v1272_v49 = vmul.f32 0.5, %v1268_v15  ;;  %v1276_v10 = vmul.f32 0.5, %v1269_v3 }
 0x30a   :  { %2795 = vtanh.f32 %v1272_v49 }
 0x30b   :  { %2797 = vtanh.f32 %v1276_v10 }
 0x30c   :  { %v1251_v4 = vpop.f32.mrf.mxu2  ;;  %v1264_v41 = vpop.f32.mrf.mxu3 }
 0x30d   :  { %v1270_v1 = vadd.f32 %v1251_v4, %v681_v5  ;;  %v1271_v59 = vadd.f32 %v1264_v41, %v3758_v39  ;;  %v1227_v42 = vpop.f32.mrf.mxu0  ;;  %v1240_v18 = vpop.f32.mrf.mxu1  ;;  %v3760_v4 = vld [vmem:[#allocation19_spill] sm:$0xff] }
 0x30e   :  { %v3761_v18 = vld [vmem:[#allocation34_spill] sm:$0xff] }
 0x30f   :  { %2799 = vtanh.f32 %v1270_v1  ;;  %v1281_v40 = vmul.f32 0.5, %v1271_v59 }
 0x310   :  { %v2796_v47 = vpop.eup %2795 }
 0x311   :  { %v2798_v51 = vpop.eup %2797  ;;  %v1274_v30 = vmul.f32 0.5, %v2796_v47  ;;  %2801 = vtanh.f32 %v1281_v40  ;;  %v3762_v47 = vld [vmem:[#allocation35_spill] sm:$0xff] }
 0x312   :  { %v1278_v58 = vmul.f32 0.5, %v2798_v51 }
 0x313   :  { %v1275_v21 = vadd.f32 0.5, %v1274_v30 }
 0x314   :  { %v1279_v50 = vadd.f32 0.5, %v1278_v58  ;;  %v1253_v54 = vpop.f32.mrf.mxu2  ;;  %v1266_v56 = vpop.f32.mrf.mxu3 }
 0x315   :  { %v2800_v52 = vpop.eup %2799 }
 0x316   :  { %v1285_v16 = vmul.f32 %v1279_v50, %v3452_v33  ;;  %v1286_v26 = vmul.f32 %v2800_v52, %v1275_v21 }
 0x317   :  { %v2802_v31 = vpop.eup %2801 }
 0x318   :  { %v3498_v0 = vadd.f32 %v1286_v26, %v1285_v16  ;;  %v1283_v15 = vmul.f32 0.5, %v2802_v31 }
 0x31a   :  { %2803 = vtanh.f32 %v3498_v0  ;;  %v1284_v3 = vadd.f32 0.5, %v1283_v15 }
 0x320   :  { %v2804_v53 = vpop.eup %2803 }
 0x321   :  { %v1289_v12 = vmul.f32 %v2804_v53, %v1284_v3 }
 0x323   :  { %v1294_v49 = vpack.c.bf16 %v1289_v12, %v1289_v12 }
 0x325   :  { %1303 = vmatmul.bf16.vlgmr.msra.gmra.mxu0 %v1294_v49  ;;  %1316 = vmatmul.bf16.vlgmr.msra.gmra.mxu1 %v1294_v49 }
 0x326   :  { %1329 = vmatmul.bf16.vlgmr.msra.gmra.mxu2 %v1294_v49  ;;  %1342 = vmatmul.bf16.vlgmr.msra.gmra.mxu3 %v1294_v49 }
 0x327   :  { %1453 = vmatpush.bf16.msra.mxu0 %v3043_v23  ;;  %1466 = vmatpush.bf16.msra.mxu1 %v3045_v27 }
 0x328   :  { %1479 = vmatpush.bf16.msra.mxu2 %v3047_v28  ;;  %1492 = vmatpush.bf16.msra.mxu3 %v3050_v32 }
 0x32b   :  { %1454 = vmatpush.bf16.msra.mxu0 %v3054_v37  ;;  %1467 = vmatpush.bf16.msra.mxu1 %v3056_v38 }
 0x32c   :  { %1480 = vmatpush.bf16.msra.mxu2 %v3059_v43  ;;  %1493 = vmatpush.bf16.msra.mxu3 %v3061_v46 }
 0x32f   :  { %1455 = vmatpush.bf16.msra.mxu0 %v3087_v57  ;;  %1468 = vmatpush.bf16.msra.mxu1 %v3089_v61 }
 0x330   :  { %1481 = vmatpush.bf16.msra.mxu2 %v3091_v62  ;;  %1494 = vmatpush.bf16.msra.mxu3 %v3094_v2 }
 0x333   :  { %1456 = vmatpush.bf16.msra.mxu0 %v3098_v6  ;;  %1469 = vmatpush.bf16.msra.mxu1 %v3100_v7 }
 0x334   :  { %1482 = vmatpush.bf16.msra.mxu2 %v3103_v11  ;;  %1495 = vmatpush.bf16.msra.mxu3 %v3105_v13 }
 0x337   :  { %1457 = vmatpush.bf16.msra.mxu0 %v3115_v17  ;;  %1470 = vmatpush.bf16.msra.mxu1 %v3117_v24 }
 0x338   :  { %1483 = vmatpush.bf16.msra.mxu2 %v3119_v25  ;;  %1496 = vmatpush.bf16.msra.mxu3 %v3122_v44 }
 0x33b   :  { %1458 = vmatpush.bf16.msra.mxu0 %v3126_v35  ;;  %1471 = vmatpush.bf16.msra.mxu1 %v3128_v36 }
 0x33c   :  { %1484 = vmatpush.bf16.msra.mxu2 %v3131_v45  ;;  %1497 = vmatpush.bf16.msra.mxu3 %v3133_v48 }
 0x33f   :  { %1459 = vmatpush.bf16.msra.mxu0 %v3143_v55  ;;  %1472 = vmatpush.bf16.msra.mxu1 %v3145_v60 }
 0x340   :  { %1485 = vmatpush.bf16.msra.mxu2 %v3147_v63  ;;  %1498 = vmatpush.bf16.msra.mxu3 %v3150_v34 }
 0x343   :  { %1460 = vmatpush.bf16.msra.mxu0 %v3154_v8  ;;  %1473 = vmatpush.bf16.msra.mxu1 %v3156_v9 }
 0x344   :  { %1486 = vmatpush.bf16.msra.mxu2 %v3159_v14  ;;  %1499 = vmatpush.bf16.msra.mxu3 %v3167_v20 }
 0x3a2   :  { %v1304_v33 = vpop.f32.mrf.mxu0  ;;  %v1317_v10 = vpop.f32.mrf.mxu1 }
 0x3a3   :  { %v1347_v5 = vadd.f32 %v1304_v33, %v3759_v22  ;;  %v1348_v41 = vadd.f32 %v1317_v10, %v3760_v4 }
 0x3a5   :  { %v1351_v1 = vmul.f32 0.5, %v1347_v5  ;;  %v1355_v39 = vmul.f32 0.5, %v1348_v41 }
 0x3a7   :  { %2805 = vtanh.f32 %v1351_v1 }
 0x3a8   :  { %2807 = vtanh.f32 %v1355_v39 }
 0x3a9   :  { %v1330_v59 = vpop.f32.mrf.mxu2  ;;  %v1343_v42 = vpop.f32.mrf.mxu3 }
 0x3aa   :  { %v1349_v40 = vadd.f32 %v1330_v59, %v3761_v18  ;;  %v1350_v51 = vadd.f32 %v1343_v42, %v3762_v47  ;;  %v1306_v30 = vpop.f32.mrf.mxu0  ;;  %v1319_v58 = vpop.f32.mrf.mxu1 }
 0x3ac   :  { %2809 = vtanh.f32 %v1349_v40  ;;  %v1360_v21 = vmul.f32 0.5, %v1350_v51 }
 0x3ad   :  { %v2806_v50 = vpop.eup %2805 }
 0x3ae   :  { %v2808_v54 = vpop.eup %2807  ;;  %v1353_v56 = vmul.f32 0.5, %v2806_v50  ;;  %2811 = vtanh.f32 %v1360_v21  ;;  %v3769_v21 = vld [vmem:[#allocation22_spill] sm:$0xff] }
 0x3af   :  { %v1357_v52 = vmul.f32 0.5, %v2808_v54  ;;  %v3770_v54 = vld [vmem:[#allocation25_spill] sm:$0xff] }
 0x3b0   :  { %v1354_v16 = vadd.f32 0.5, %v1353_v56 }
 0x3b1   :  { %v1358_v26 = vadd.f32 0.5, %v1357_v52  ;;  %v1332_v31 = vpop.f32.mrf.mxu2  ;;  %v1345_v15 = vpop.f32.mrf.mxu3 }
 0x3b2   :  { %v2810_v3 = vpop.eup %2809  ;;  %v3771_v15 = vld [vmem:[#allocation38_spill] sm:$0xff] }
 0x3b3   :  { %v1364_v53 = vmul.f32 %v1358_v26, %v3498_v0  ;;  %v1365_v12 = vmul.f32 %v2810_v3, %v1354_v16 }
 0x3b4   :  { %v2812_v49 = vpop.eup %2811 }
 0x3b5   :  { %v3538_v33 = vadd.f32 %v1365_v12, %v1364_v53  ;;  %v1362_v10 = vmul.f32 0.5, %v2812_v49  ;;  %v3772_v53 = vld [vmem:[#allocation39_spill] sm:$0xff] }
 0x3b7   :  { %2813 = vtanh.f32 %v3538_v33  ;;  %v1363_v22 = vadd.f32 0.5, %v1362_v10 }
 0x3bd   :  { %v2814_v5 = vpop.eup %2813 }
 0x3be   :  { %v1368_v4 = vmul.f32 %v2814_v5, %v1363_v22 }
 0x3c0   :  { %v1373_v41 = vpack.c.bf16 %v1368_v4, %v1368_v4 }
 0x3c2   :  { %1382 = vmatmul.bf16.vlgmr.msrb.gmra.mxu0 %v1373_v41  ;;  %1395 = vmatmul.bf16.vlgmr.msrb.gmra.mxu1 %v1373_v41 }
 0x3c3   :  { %1408 = vmatmul.bf16.vlgmr.msrb.gmra.mxu2 %v1373_v41  ;;  %1421 = vmatmul.bf16.vlgmr.msrb.gmra.mxu3 %v1373_v41 }
 0x3c4   :  { %1532 = vmatpush.bf16.msrb.mxu0 %v3043_v23  ;;  %1545 = vmatpush.bf16.msrb.mxu1 %v3045_v27  ;;  %v3763_v23 = vld [vmem:[#allocation17_spill] sm:$0xff] }
 0x3c5   :  { %1558 = vmatpush.bf16.msrb.mxu2 %v3047_v28  ;;  %1571 = vmatpush.bf16.msrb.mxu3 %v3050_v32  ;;  %v541_v27 = vadd.f32 %v3763_v23, %v3210_v19  ;;  %v3764_v28 = vld [vmem:[#allocation20_spill] sm:$0xff] }
 0x3c6   :  { %v599_v32 = vadd.f32 %v3764_v28, %v3219_v29 }
 0x3c8   :  { %1533 = vmatpush.bf16.msrb.mxu0 %v3054_v37  ;;  %1546 = vmatpush.bf16.msrb.mxu1 %v3056_v38  ;;  %v3765_v37 = vld [vmem:[#allocation18_spill] sm:$0xff] }
 0x3c9   :  { %1559 = vmatpush.bf16.msrb.mxu2 %v3059_v43  ;;  %1572 = vmatpush.bf16.msrb.mxu3 %v3061_v46  ;;  %v570_v38 = vadd.f32 %v3765_v37, %v541_v27  ;;  %v3766_v43 = vld [vmem:[#allocation21_spill] sm:$0xff] }
 0x3ca   :  { %v628_v46 = vadd.f32 %v3766_v43, %v599_v32 }
 0x3cc   :  { %1534 = vmatpush.bf16.msrb.mxu0 %v3087_v57  ;;  %1547 = vmatpush.bf16.msrb.mxu1 %v3089_v61 }
 0x3cd   :  { %1560 = vmatpush.bf16.msrb.mxu2 %v3091_v62  ;;  %1573 = vmatpush.bf16.msrb.mxu3 %v3094_v2 }
 0x3d0   :  { %1535 = vmatpush.bf16.msrb.mxu0 %v3098_v6  ;;  %1548 = vmatpush.bf16.msrb.mxu1 %v3100_v7 }
 0x3d1   :  { %1561 = vmatpush.bf16.msrb.mxu2 %v3103_v11  ;;  %1574 = vmatpush.bf16.msrb.mxu3 %v3105_v13 }
 0x3d4   :  { %1536 = vmatpush.bf16.msrb.mxu0 %v3115_v17  ;;  %1549 = vmatpush.bf16.msrb.mxu1 %v3117_v24  ;;  %v3767_v17 = vld [vmem:[#allocation36_spill] sm:$0xff] }
 0x3d5   :  { %1562 = vmatpush.bf16.msrb.mxu2 %v3119_v25  ;;  %1575 = vmatpush.bf16.msrb.mxu3 %v3122_v44  ;;  %v3768_v25 = vld [vmem:[#allocation37_spill] sm:$0xff] }
 0x3d8   :  { %1537 = vmatpush.bf16.msrb.mxu0 %v3126_v35  ;;  %1550 = vmatpush.bf16.msrb.mxu1 %v3128_v36 }
 0x3d9   :  { %1563 = vmatpush.bf16.msrb.mxu2 %v3131_v45  ;;  %1576 = vmatpush.bf16.msrb.mxu3 %v3133_v48 }
 0x3dc   :  { %1538 = vmatpush.bf16.msrb.mxu0 %v3143_v55  ;;  %1551 = vmatpush.bf16.msrb.mxu1 %v3145_v60 }
 0x3dd   :  { %1564 = vmatpush.bf16.msrb.mxu2 %v3147_v63  ;;  %1577 = vmatpush.bf16.msrb.mxu3 %v3150_v34 }
 0x3e0   :  { %1539 = vmatpush.bf16.msrb.mxu0 %v3154_v8  ;;  %1552 = vmatpush.bf16.msrb.mxu1 %v3156_v9 }
 0x3e1   :  { %1565 = vmatpush.bf16.msrb.mxu2 %v3159_v14  ;;  %1578 = vmatpush.bf16.msrb.mxu3 %v3167_v20 }
 0x43f   :  { %v1383_v57 = vpop.f32.mrf.mxu0  ;;  %v1396_v61 = vpop.f32.mrf.mxu1 }
 0x440   :  { %v1426_v62 = vadd.f32 %v1383_v57, %v570_v38  ;;  %v1427_v2 = vadd.f32 %v1396_v61, %v628_v46 }
 0x442   :  { %v1430_v6 = vmul.f32 0.5, %v1426_v62  ;;  %v1434_v7 = vmul.f32 0.5, %v1427_v2 }
 0x444   :  { %2815 = vtanh.f32 %v1430_v6 }
 0x445   :  { %2817 = vtanh.f32 %v1434_v7 }
 0x446   :  { %v1409_v11 = vpop.f32.mrf.mxu2  ;;  %v1422_v13 = vpop.f32.mrf.mxu3 }
 0x447   :  { %v1428_v24 = vadd.f32 %v1409_v11, %v3767_v17  ;;  %v1429_v44 = vadd.f32 %v1422_v13, %v3768_v25  ;;  %v1385_v35 = vpop.f32.mrf.mxu0  ;;  %v1398_v36 = vpop.f32.mrf.mxu1  ;;  %v2471_v11 = vld [vmem:[%s3710_s4 + $0x70] sm:$0xf]  ;;  %v2724_v13 = vld [vmem:[%s3710_s4 + $0x74] sm:$0xf0]  ;;  %v2723_v17 = vld [vmem:[%s3710_s4 + $0x74] sm:$0xf] }
 0x448   :  { %v2473_v25 = vld [vmem:[%s3710_s4 + $0x78] sm:$0xf0]  ;;  %v2463_v35 = vld [vmem:[%s3710_s4 + $0x60] sm:$0xf]  ;;  %v2722_v36 = vld [vmem:[%s3710_s4 + $0x64] sm:$0xf0] }
 0x449   :  { %2819 = vtanh.f32 %v1428_v24  ;;  %v1439_v45 = vmul.f32 0.5, %v1429_v44  ;;  %v2472_v24 = vor.u32 %v2724_v13, %v2471_v11  ;;  %v2476_v44 = vor.u32 %v2723_v17, %v2473_v25  ;;  %v2756_v13 = vld [vmem:[#allocation7 + $0xf4] sm:$0xf0]  ;;  %v2739_v17 = vld [vmem:[#allocation7 + $0x74] sm:$0xf] }
 0x44a   :  { %v2816_v48 = vpop.eup %2815 }
 0x44b   :  { %v2818_v55 = vpop.eup %2817  ;;  %v1432_v60 = vmul.f32 0.5, %v2816_v48  ;;  %2821 = vtanh.f32 %v1439_v45  ;;  %v2721_v45 = vld [vmem:[%s3710_s4 + $0x64] sm:$0xf]  ;;  %v2464_v48 = vor.u32 %v2722_v36, %v2463_v35  ;;  %v2755_v35 = vld [vmem:[#allocation7 + $0xf4] sm:$0xf] }
 0x44c   :  { %v1436_v63 = vmul.f32 0.5, %v2818_v55  ;;  %v2465_v55 = vld [vmem:[%s3710_s4 + $0x68] sm:$0xf0]  ;;  %v2601_v36 = vld [vmem:[#allocation7 + $0xf8] sm:$0xf0] }
 0x44d   :  { %v1433_v34 = vadd.f32 0.5, %v1432_v60  ;;  %v2468_v60 = vor.u32 %v2721_v45, %v2465_v55  ;;  %v2527_v45 = vld [vmem:[#allocation7 + $0x60] sm:$0xf] }
 0x44e   :  { %v1437_v8 = vadd.f32 0.5, %v1436_v63  ;;  %v1411_v9 = vpop.f32.mrf.mxu2  ;;  %v1424_v14 = vpop.f32.mrf.mxu3  ;;  %v2455_v63 = vld [vmem:[%s3710_s4 + $0x50] sm:$0xf] }
 0x44f   :  { %v2820_v20 = vpop.eup %2819  ;;  %v2457_v14 = vld [vmem:[%s3710_s4 + $0x58] sm:$0xf0] }
 0x450   :  { %v1443_v0 = vmul.f32 %v1437_v8, %v3538_v33  ;;  %v1444_v1 = vmul.f32 %v2820_v20, %v1433_v34  ;;  %v2720_v34 = vld [vmem:[%s3710_s4 + $0x54] sm:$0xf0]  ;;  %v2719_v8 = vld [vmem:[%s3710_s4 + $0x54] sm:$0xf] }
 0x451   :  { %v2822_v39 = vpop.eup %2821  ;;  %v2456_v9 = vor.u32 %v2720_v34, %v2455_v63  ;;  %v2460_v20 = vor.u32 %v2719_v8, %v2457_v14  ;;  %v2738_v63 = vld [vmem:[#allocation7 + $0x64] sm:$0xf0]  ;;  %v2591_v34 = vld [vmem:[#allocation7 + $0xe0] sm:$0xf]  ;;  %v2737_v14 = vld [vmem:[#allocation7 + $0x64] sm:$0xf] }
 0x452   :  { %v1445_v59 = vadd.f32 %v1444_v1, %v1443_v0  ;;  %v1441_v42 = vmul.f32 0.5, %v2822_v39  ;;  %v2447_v0 = vld [vmem:[%s3710_s4 + $0x40] sm:$0xf]  ;;  %v2718_v1 = vld [vmem:[%s3710_s4 + $0x44] sm:$0xf0]  ;;  %v2528_v8 = vor.u32 %v2738_v63, %v2527_v45 }
 0x453   :  { %v2717_v39 = vld [vmem:[%s3710_s4 + $0x44] sm:$0xf] }
 0x454   :  { %2823 = vtanh.f32 %v1445_v59  ;;  %v1442_v18 = vadd.f32 0.5, %v1441_v42  ;;  %v2449_v42 = vld [vmem:[%s3710_s4 + $0x48] sm:$0xf0] }
 0x45a   :  { %v2824_v40 = vpop.eup %2823 }
 0x45b   :  { %v1447_v47 = vmul.f32 %v2824_v40, %v1442_v18  ;;  %v2452_v18 = vor.u32 %v2717_v39, %v2449_v42  ;;  %v2439_v40 = vld [vmem:[%s3710_s4 + $0x30] sm:$0xf]  ;;  %v2753_v39 = vld [vmem:[#allocation7 + $0xe4] sm:$0xf] }
 0x45c   :  { %v2519_v42 = vld [vmem:[#allocation7 + $0x50] sm:$0xf] }
 0x45d   :  { %v1452_v51 = vpack.c.bf16 %v1447_v47, %v1447_v47  ;;  %v2716_v47 = vld [vmem:[%s3710_s4 + $0x34] sm:$0xf0] }
 0x45f   :  { %1461 = vmatmul.bf16.vlgmr.msra.gmra.mxu0 %v1452_v51  ;;  %1474 = vmatmul.bf16.vlgmr.msra.gmra.mxu1 %v1452_v51 }
 0x460   :  { %1487 = vmatmul.bf16.vlgmr.msra.gmra.mxu2 %v1452_v51  ;;  %1500 = vmatmul.bf16.vlgmr.msra.gmra.mxu3 %v1452_v51  ;;  %v2715_v51 = vld [vmem:[%s3710_s4 + $0x34] sm:$0xf] }
 0x461   :  { %1709 = vmatpush.bf16.msra.mxu0 %v2472_v24  ;;  %1722 = vmatpush.bf16.msra.mxu1 %v2476_v44  ;;  %v2537_v24 = vld [vmem:[#allocation7 + $0x78] sm:$0xf0] }
 0x462   :  { %v2540_v44 = vor.u32 %v2739_v17, %v2537_v24  ;;  %v2505_v17 = vld [vmem:[#allocation7 + $0x38] sm:$0xf0] }
 0x465   :  { %1710 = vmatpush.bf16.msra.mxu0 %v2464_v48  ;;  %1723 = vmatpush.bf16.msra.mxu1 %v2468_v60  ;;  %v2604_v60 = vor.u32 %v2755_v35, %v2601_v36 }
 0x469   :  { %1711 = vmatpush.bf16.msra.mxu0 %v2456_v9  ;;  %1724 = vmatpush.bf16.msra.mxu1 %v2460_v20  ;;  %v2754_v9 = vld [vmem:[#allocation7 + $0xe4] sm:$0xf0]  ;;  %v2529_v20 = vld [vmem:[#allocation7 + $0x68] sm:$0xf0] }
 0x46d   :  { %1725 = vmatpush.bf16.msra.mxu1 %v2452_v18 }
 0x4dc   :  { %v1462_v30 = vpop.f32.mrf.mxu0  ;;  %v1475_v58 = vpop.f32.mrf.mxu1 }
 0x4dd   :  { %v1505_v50 = vadd.f32 %v1462_v30, %v3769_v21  ;;  %v1506_v56 = vadd.f32 %v1475_v58, %v3770_v54  ;;  %v2440_v30 = vor.u32 %v2716_v47, %v2439_v40  ;;  %v2441_v58 = vld [vmem:[%s3710_s4 + $0x38] sm:$0xf0]  ;;  %v2714_v54 = vld [vmem:[%s3710_s4 + $0x24] sm:$0xf0]  ;;  %v2736_v40 = vld [vmem:[#allocation7 + $0x54] sm:$0xf0] }
 0x4de   :  { %v2444_v21 = vor.u32 %v2715_v51, %v2441_v58  ;;  %v2583_v47 = vld [vmem:[#allocation7 + $0xd0] sm:$0xf]  ;;  %v2752_v51 = vld [vmem:[#allocation7 + $0xd4] sm:$0xf0] }
 0x4df   :  { %v1509_v52 = vmul.f32 0.5, %v1505_v50  ;;  %v1513_v16 = vmul.f32 0.5, %v1506_v56  ;;  %v2431_v50 = vld [vmem:[%s3710_s4 + $0x20] sm:$0xf]  ;;  %v2713_v56 = vld [vmem:[%s3710_s4 + $0x24] sm:$0xf] }
 0x4e0   :  { %1726 = vmatpush.bf16.msra.mxu1 %v2444_v21  ;;  %v2520_v21 = vor.u32 %v2736_v40, %v2519_v42  ;;  %v2745_v42 = vld [vmem:[#allocation7 + $0xa4] sm:$0xf] }
 0x4e1   :  { %2825 = vtanh.f32 %v1509_v52  ;;  %v2432_v52 = vor.u32 %v2714_v54, %v2431_v50  ;;  %v2584_v50 = vor.u32 %v2752_v51, %v2583_v47  ;;  %v2735_v54 = vld [vmem:[#allocation7 + $0x54] sm:$0xf] }
 0x4e2   :  { %2827 = vtanh.f32 %v1513_v16  ;;  %v2433_v16 = vld [vmem:[%s3710_s4 + $0x28] sm:$0xf0] }
 0x4e3   :  { %v1488_v26 = vpop.f32.mrf.mxu2  ;;  %v1501_v31 = vpop.f32.mrf.mxu3 }
 0x4e4   :  { %v1507_v3 = vadd.f32 %v1488_v26, %v3771_v15  ;;  %v1508_v12 = vadd.f32 %v1501_v31, %v3772_v53  ;;  %v1464_v49 = vpop.f32.mrf.mxu0  ;;  %v1477_v33 = vpop.f32.mrf.mxu1  ;;  %v2436_v26 = vor.u32 %v2713_v56, %v2433_v16  ;;  %v2423_v31 = vld [vmem:[%s3710_s4 + $0x10] sm:$0xf]  ;;  %v2712_v15 = vld [vmem:[%s3710_s4 + $0x14] sm:$0xf0]  ;;  %v2521_v56 = vld [vmem:[#allocation7 + $0x58] sm:$0xf0] }
 0x4e5   :  { %v2424_v53 = vor.u32 %v2712_v15, %v2423_v31  ;;  %v2415_v33 = vld [vmem:[%s3710_s4] sm:$0xf]  ;;  %v3777_v16 = vld [vmem:[#allocation40_spill] sm:$0xff]  ;;  %v3778_v31 = vld [vmem:[#allocation41_spill] sm:$0xff] }
 0x4e6   :  { %2829 = vtanh.f32 %v1507_v3  ;;  %v1518_v10 = vmul.f32 0.5, %v1508_v12  ;;  %1727 = vmatpush.bf16.msra.mxu1 %v2436_v26  ;;  %v2711_v3 = vld [vmem:[%s3710_s4 + $0x14] sm:$0xf]  ;;  %v2425_v12 = vld [vmem:[%s3710_s4 + $0x18] sm:$0xf0] }
 0x4e7   :  { %v2826_v22 = vpop.eup %2825  ;;  %v2428_v49 = vor.u32 %v2711_v3, %v2425_v12  ;;  %v2524_v12 = vor.u32 %v2735_v54, %v2521_v56 }
 0x4e8   :  { %v2828_v5 = vpop.eup %2827  ;;  %v1511_v4 = vmul.f32 0.5, %v2826_v22  ;;  %2831 = vtanh.f32 %v1518_v10  ;;  %v2710_v10 = vld [vmem:[%s3710_s4 + $0x4] sm:$0xf0]  ;;  %v2709_v22 = vld [vmem:[%s3710_s4 + $0x4] sm:$0xf] }
 0x4e9   :  { %v1515_v41 = vmul.f32 0.5, %v2828_v5  ;;  %v3773_v5 = vld [vmem:[#allocation23_spill] sm:$0xff] }
 0x4ea   :  { %v1512_v23 = vadd.f32 0.5, %v1511_v4  ;;  %1728 = vmatpush.bf16.msra.mxu1 %v2428_v49  ;;  %v546_v4 = vadd.f32 %v3773_v5, %v3210_v19  ;;  %v2599_v19 = vld [vmem:[#allocation7 + $0xf0] sm:$0xf]  ;;  %v2585_v49 = vld [vmem:[#allocation7 + $0xd8] sm:$0xf0] }
 0x4eb   :  { %v1516_v27 = vadd.f32 0.5, %v1515_v41  ;;  %v1490_v28 = vpop.f32.mrf.mxu2  ;;  %v1503_v32 = vpop.f32.mrf.mxu3  ;;  %v3774_v41 = vld [vmem:[#allocation26_spill] sm:$0xff]  ;;  %v2600_v25 = vor.u32 %v2756_v13, %v2599_v19  ;;  %v2567_v19 = vld [vmem:[#allocation7 + $0xb0] sm:$0xf]  ;;  %v2731_v13 = vld [vmem:[#allocation7 + $0x34] sm:$0xf] }
 0x4ec   :  { %v2830_v37 = vpop.eup %2829  ;;  %v2417_v28 = vld [vmem:[%s3710_s4 + $0x8] sm:$0xf0]  ;;  %v2575_v5 = vld [vmem:[#allocation7 + $0xc0] sm:$0xf]  ;;  %v2508_v63 = vor.u32 %v2731_v13, %v2505_v17 }
 0x4ed   :  { %v1522_v38 = vmul.f32 %v1516_v27, %v1445_v59  ;;  %v1523_v43 = vmul.f32 %v2830_v37, %v1512_v23  ;;  %v2448_v59 = vor.u32 %v2718_v1, %v2447_v0  ;;  %v604_v23 = vadd.f32 %v3774_v41, %v3219_v29  ;;  %v3775_v37 = vld [vmem:[#allocation24_spill] sm:$0xff]  ;;  %1950 = vmatpush.bf16.msra.mxu3 %v2600_v25  ;;  %v2733_v41 = vld [vmem:[#allocation7 + $0x44] sm:$0xf] }
 0x4ee   :  { %v2832_v46 = vpop.eup %2831  ;;  %v2416_v27 = vor.u32 %v2710_v10, %v2415_v33  ;;  %v2420_v32 = vor.u32 %v2709_v22, %v2417_v28  ;;  %v2592_v0 = vor.u32 %v2754_v9, %v2591_v34  ;;  %v2532_v1 = vor.u32 %v2737_v14, %v2529_v20  ;;  %v2511_v33 = vld [vmem:[#allocation7 + $0x40] sm:$0xf]  ;;  %v2734_v10 = vld [vmem:[#allocation7 + $0x44] sm:$0xf0]  ;;  %v2749_v28 = vld [vmem:[#allocation7 + $0xc4] sm:$0xf] }
 0x4ef   :  { %v3586_v57 = vadd.f32 %v1523_v43, %v1522_v38  ;;  %v1520_v61 = vmul.f32 0.5, %v2832_v46  ;;  %1712 = vmatpush.bf16.msra.mxu0 %v2448_v59  ;;  %v575_v38 = vadd.f32 %v3775_v37, %v546_v4  ;;  %v3776_v43 = vld [vmem:[#allocation27_spill] sm:$0xff]  ;;  %v2512_v37 = vor.u32 %v2734_v10, %v2511_v33  ;;  %v2747_v25 = vld [vmem:[#allocation7 + $0xb4] sm:$0xf]  ;;  %v2495_v34 = vld [vmem:[#allocation7 + $0x20] sm:$0xf] }
 0x4f0   :  { %1729 = vmatpush.bf16.msra.mxu1 %v2420_v32  ;;  %v633_v46 = vadd.f32 %v3776_v43, %v604_v23  ;;  %v2593_v59 = vld [vmem:[#allocation7 + $0xe8] sm:$0xf0]  ;;  %v2750_v4 = vld [vmem:[#allocation7 + $0xc4] sm:$0xf0]  ;;  %v2503_v43 = vld [vmem:[#allocation7 + $0x30] sm:$0xf] }
 0x4f1   :  { %2833 = vtanh.f32 %v3586_v57  ;;  %v1521_v62 = vadd.f32 0.5, %v1520_v61  ;;  %v2596_v18 = vor.u32 %v2753_v39, %v2593_v59  ;;  %1951 = vmatpush.bf16.msra.mxu3 %v2592_v0  ;;  %v2559_v9 = vld [vmem:[#allocation7 + $0xa0] sm:$0xf]  ;;  %v2729_v39 = vld [vmem:[#allocation7 + $0x24] sm:$0xf] }
 0x4f2   :  { %v2497_v59 = vld [vmem:[#allocation7 + $0x28] sm:$0xf0]  ;;  %v2743_v10 = vld [vmem:[#allocation7 + $0x94] sm:$0xf] }
 0x4f3   :  { %1713 = vmatpush.bf16.msra.mxu0 %v2440_v30 }
 0x4f5   :  { %1952 = vmatpush.bf16.msra.mxu3 %v2584_v50 }
 0x4f7   :  { %v2834_v2 = vpop.eup %2833  ;;  %1714 = vmatpush.bf16.msra.mxu0 %v2432_v52  ;;  %v2751_v52 = vld [vmem:[#allocation7 + $0xd4] sm:$0xf] }
 0x4f8   :  { %v1526_v6 = vmul.f32 %v2834_v2, %v1521_v62  ;;  %v2535_v2 = vld [vmem:[#allocation7 + $0x70] sm:$0xf]  ;;  %v2588_v22 = vor.u32 %v2751_v52, %v2585_v49 }
 0x4fa   :  { %v1531_v7 = vpack.c.bf16 %v1526_v6, %v1526_v6  ;;  %v2740_v6 = vld [vmem:[#allocation7 + $0x74] sm:$0xf0] }
 0x4fb   :  { %1715 = vmatpush.bf16.msra.mxu0 %v2424_v53  ;;  %v2536_v29 = vor.u32 %v2740_v6, %v2535_v2  ;;  %v2576_v2 = vor.u32 %v2750_v4, %v2575_v5  ;;  %v2479_v4 = vld [vmem:[#allocation7] sm:$0xf] }
 0x4fc   :  { %1540 = vmatmul.bf16.vlgmr.msrb.gmra.mxu0 %v1531_v7  ;;  %1553 = vmatmul.bf16.vlgmr.msrb.gmra.mxu1 %v1531_v7 }
 0x4fd   :  { %1566 = vmatmul.bf16.vlgmr.msrb.gmra.mxu2 %v1531_v7  ;;  %1579 = vmatmul.bf16.vlgmr.msrb.gmra.mxu3 %v1531_v7 }
 0x4fe   :  { %1937 = vmatpush.bf16.msra.mxu2 %v2536_v29  ;;  %1976 = vmatpush.bf16.msrb.mxu1 %v2604_v60 }
 0x4ff   :  { %1716 = vmatpush.bf16.msra.mxu0 %v2416_v27  ;;  %v2513_v27 = vld [vmem:[#allocation7 + $0x48] sm:$0xf0]  ;;  %1953 = vmatpush.bf16.msra.mxu3 %v2576_v2  ;;  %v1623_v2 = vld [vmem:[%s3711_s5] sm:$0x3] }
 0x500   :  { %v2516_v6 = vor.u32 %v2733_v41, %v2513_v27  ;;  %v2726_v41 = vld [vmem:[#allocation7 + $0x4] sm:$0xf0] }
 0x501   :  { %v2480_v27 = vor.u32 %v2726_v41, %v2479_v4 }
 0x502   :  { %1938 = vmatpush.bf16.msra.mxu2 %v2528_v8  ;;  %1977 = vmatpush.bf16.msrb.mxu1 %v2596_v18  ;;  %v2730_v8 = vld [vmem:[#allocation7 + $0x24] sm:$0xf0]  ;;  %v2561_v18 = vld [vmem:[#allocation7 + $0xa8] sm:$0xf0] }
 0x503   :  { %1963 = vmatpush.bf16.msrb.mxu0 %v2540_v44  ;;  %v2569_v44 = vld [vmem:[#allocation7 + $0xb8] sm:$0xf0]  ;;  %v2496_v51 = vor.u32 %v2730_v8, %v2495_v34 }
 0x504   :  { %v2572_v0 = vor.u32 %v2747_v25, %v2569_v44 }
 0x506   :  { %1939 = vmatpush.bf16.msra.mxu2 %v2520_v21  ;;  %1978 = vmatpush.bf16.msrb.mxu1 %v2588_v22  ;;  %v2564_v21 = vor.u32 %v2745_v42, %v2561_v18  ;;  %v2553_v22 = vld [vmem:[#allocation7 + $0x98] sm:$0xf0] }
 0x507   :  { %1964 = vmatpush.bf16.msrb.mxu0 %v2532_v1  ;;  %v2746_v1 = vld [vmem:[#allocation7 + $0xa4] sm:$0xf0]  ;;  %v2556_v5 = vor.u32 %v2743_v10, %v2553_v22 }
 0x50a   :  { %1940 = vmatpush.bf16.msra.mxu2 %v2512_v37  ;;  %v2481_v37 = vld [vmem:[#allocation7 + $0x8] sm:$0xf0] }
 0x50b   :  { %1965 = vmatpush.bf16.msrb.mxu0 %v2524_v12  ;;  %v2489_v12 = vld [vmem:[#allocation7 + $0x18] sm:$0xf0] }
 0x50f   :  { %1966 = vmatpush.bf16.msrb.mxu0 %v2516_v6  ;;  %v1625_v6 = vperm.slane %v1623_v2, 0 }
 0x513   :  { %1967 = vmatpush.bf16.msrb.mxu0 %v2508_v63 }
 0x579   :  { %v1541_v61 = vpop.f32.mrf.mxu0  ;;  %v1554_v62 = vpop.f32.mrf.mxu1 }
 0x57a   :  { %v1584_v7 = vadd.f32 %v1541_v61, %v575_v38  ;;  %v1585_v11 = vadd.f32 %v1554_v62, %v633_v46  ;;  %v2577_v38 = vld [vmem:[#allocation7 + $0xc8] sm:$0xf0]  ;;  %v2732_v46 = vld [vmem:[#allocation7 + $0x34] sm:$0xf0] }
 0x57b   :  { %v2580_v29 = vor.u32 %v2749_v28, %v2577_v38  ;;  %v2742_v28 = vld [vmem:[#allocation7 + $0x84] sm:$0xf0] }
 0x57c   :  { %v1588_v48 = vmul.f32 0.5, %v1584_v7  ;;  %v1592_v55 = vmul.f32 0.5, %v1585_v11  ;;  %v2748_v7 = vld [vmem:[#allocation7 + $0xb4] sm:$0xf0] }
 0x57d   :  { %v2568_v60 = vor.u32 %v2748_v7, %v2567_v19  ;;  %1979 = vmatpush.bf16.msrb.mxu1 %v2580_v29  ;;  %v1626_v19 = vperm.slane %v1623_v2, 1 }
 0x57e   :  { %2835 = vtanh.f32 %v1588_v48  ;;  %v2504_v48 = vor.u32 %v2732_v46, %v2503_v43  ;;  %v2741_v46 = vld [vmem:[#allocation7 + $0x84] sm:$0xf] }
 0x57f   :  { %2837 = vtanh.f32 %v1592_v55  ;;  %1954 = vmatpush.bf16.msra.mxu3 %v2568_v60 }
 0x580   :  { %v1567_v30 = vpop.f32.mrf.mxu2  ;;  %v1580_v58 = vpop.f32.mrf.mxu3  ;;  %1941 = vmatpush.bf16.msra.mxu2 %v2504_v48 }
 0x581   :  { %v1586_v26 = vadd.f32 %v1567_v30, %v3777_v16  ;;  %v1587_v15 = vadd.f32 %v1580_v58, %v3778_v31  ;;  %v1543_v3 = vpop.f32.mrf.mxu0  ;;  %v1556_v53 = vpop.f32.mrf.mxu1  ;;  %v2560_v30 = vor.u32 %v2746_v1, %v2559_v9  ;;  %v2500_v58 = vor.u32 %v2729_v39, %v2497_v59  ;;  %1980 = vmatpush.bf16.msrb.mxu1 %v2572_v0  ;;  %v2487_v16 = vld [vmem:[#allocation7 + $0x10] sm:$0xf] }
 0x582   :  { %v2551_v31 = vld [vmem:[#allocation7 + $0x90] sm:$0xf]  ;;  %v2744_v3 = vld [vmem:[#allocation7 + $0x94] sm:$0xf0]  ;;  %v2727_v53 = vld [vmem:[#allocation7 + $0x14] sm:$0xf] }
 0x583   :  { %2839 = vtanh.f32 %v1586_v26  ;;  %v1597_v23 = vmul.f32 0.5, %v1587_v15  ;;  %1955 = vmatpush.bf16.msra.mxu3 %v2560_v30  ;;  %1968 = vmatpush.bf16.msrb.mxu0 %v2500_v58  ;;  %v2728_v26 = vld [vmem:[#allocation7 + $0x14] sm:$0xf0]  ;;  %v2552_v49 = vor.u32 %v2744_v3, %v2551_v31  ;;  %v2492_v33 = vor.u32 %v2727_v53, %v2489_v12 }
 0x584   :  { %v2836_v32 = vpop.eup %2835  ;;  %1942 = vmatpush.bf16.msra.mxu2 %v2496_v51  ;;  %v2488_v15 = vor.u32 %v2728_v26, %v2487_v16 }
 0x585   :  { %v2838_v61 = vpop.eup %2837  ;;  %v1590_v62 = vmul.f32 0.5, %v2836_v32  ;;  %2841 = vtanh.f32 %v1597_v23  ;;  %1981 = vmatpush.bf16.msrb.mxu1 %v2564_v21  ;;  %v2543_v23 = vld [vmem:[#allocation7 + $0x80] sm:$0xf]  ;;  %v2725_v32 = vld [vmem:[#allocation7 + $0x4] sm:$0xf] }
 0x586   :  { %v1594_v11 = vmul.f32 0.5, %v2838_v61  ;;  %v2544_v38 = vor.u32 %v2742_v28, %v2543_v23  ;;  %v2484_v43 = vor.u32 %v2725_v32, %v2481_v37  ;;  %v2545_v61 = vld [vmem:[#allocation7 + $0x88] sm:$0xf0] }
 0x587   :  { %v1591_v24 = vadd.f32 0.5, %v1590_v62  ;;  %1956 = vmatpush.bf16.msra.mxu3 %v2552_v49  ;;  %1969 = vmatpush.bf16.msrb.mxu0 %v2492_v33  ;;  %v2548_v62 = vor.u32 %v2741_v46, %v2545_v61 }
 0x588   :  { %v1595_v35 = vadd.f32 0.5, %v1594_v11  ;;  %v1569_v36 = vpop.f32.mrf.mxu2  ;;  %v1582_v45 = vpop.f32.mrf.mxu3  ;;  %1943 = vmatpush.bf16.msra.mxu2 %v2488_v15 }
 0x589   :  { %v2840_v55 = vpop.eup %2839  ;;  %1982 = vmatpush.bf16.msrb.mxu1 %v2556_v5  ;;  %v1771_v45 = vld [vmem:[%s3713_s7] sm:$0x3] }
 0x58a   :  { %v1601_v14 = vmul.f32 %v1595_v35, %v3586_v57  ;;  %v1602_v20 = vmul.f32 %v2840_v55, %v1591_v24  ;;  %v1774_v48 = vperm.slane %v1771_v45, 1  ;;  %v1773_v34 = vperm.slane %v1771_v45, 0 }
 0x58b   :  { %v2842_v40 = vpop.eup %2841  ;;  %1957 = vmatpush.bf16.msra.mxu3 %v2544_v38  ;;  %1970 = vmatpush.bf16.msrb.mxu0 %v2484_v43 }
 0x58c   :  { %v1603_v47 = vadd.f32 %v1602_v20, %v1601_v14  ;;  %v1599_v57 = vmul.f32 0.5, %v2842_v40  ;;  %1944 = vmatpush.bf16.msra.mxu2 %v2480_v27 }
 0x58d   :  { %1983 = vmatpush.bf16.msrb.mxu1 %v2548_v62 }
 0x58e   :  { %2843 = vtanh.f32 %v1603_v47  ;;  %v1600_v50 = vadd.f32 0.5, %v1599_v57 }
 0x594   :  { %v2844_v54 = vpop.eup %2843 }
 0x595   :  { %v1605_v56 = vmul.f32 %v2844_v54, %v1600_v50 }
 0x597   :  { %v1606_v52 = vpack.c.bf16 %v1605_v56, %v1605_v56 }
 0x599   :  { %1717 = vmatmul.bf16.vlgmr.msra.gmra.mxu0 %v1606_v52  ;;  %1730 = vmatmul.bf16.vlgmr.msra.gmra.mxu1 %v1606_v52 }
 0x616   :  { %v1718_v7 = vpop.f32.mrf.mxu0  ;;  %v1731_v11 = vpop.f32.mrf.mxu1 }
 0x617   :  { %v1719_v29 = vadd.f32 %v1718_v7, %v1625_v6  ;;  %v1732_v13 = vadd.f32 %v1731_v11, %v1626_v19 }
 0x619   :  { %v1735_v17 = vmax.f32 %v1719_v29, 0.0  ;;  %v1736_v24 = vmax.f32 %v1732_v13, 0.0 }
 0x61b   :  { %v1737_v25 = vpack.c.bf16 %v1735_v17, %v1735_v17  ;;  %v1738_v44 = vpack.c.bf16 %v1736_v24, %v1736_v24 }
 0x61d   :  { %1945 = vmatmul.bf16.vlgmr.msra.gmra.mxu2 %v1737_v25  ;;  %1958 = vmatmul.bf16.vlgmr.msra.gmra.mxu3 %v1738_v44 }
 0x61e   :  { %1971 = vmatmul.bf16.vlgmr.msrb.gmra.mxu0 %v1737_v25  ;;  %1984 = vmatmul.bf16.vlgmr.msrb.gmra.mxu1 %v1738_v44  ;;  %v1720_v35 = vpop.f32.mrf.mxu0  ;;  %v1733_v36 = vpop.f32.mrf.mxu1 }
 0x69b   :  { %v1972_v55 = vpop.f32.mrf.mxu0  ;;  %v1985_v60 = vpop.f32.mrf.mxu1 }
 0x69c   :  { %v1973_v63 = vadd.f32 %v1972_v55, %v1774_v48 }
 0x69e   :  { %v1986_v8 = vadd.f32 %v1985_v60, %v1973_v63 }
 0x6a0   :  { %1990 = vst [vmem:[%s3714_s8 + $0x8] sm:$0xff] %v1986_v8  ;;  %v1946_v9 = vpop.f32.mrf.mxu2  ;;  %v1959_v14 = vpop.f32.mrf.mxu3 }
 0x6a1   :  { %v1947_v20 = vadd.f32 %v1946_v9, %v1773_v34 }
 0x6a3   :  { %v1960_v0 = vadd.f32 %v1959_v14, %v1947_v20  ;;  %v1974_v1 = vpop.f32.mrf.mxu0  ;;  %v1987_v39 = vpop.f32.mrf.mxu1 }
 0x6a5   :  { %1989 = vst [vmem:[%s3714_s8] sm:$0xff] %v1960_v0 }
 0x6a8   :  { %v1948_v59 = vpop.f32.mrf.mxu2  ;;  %v1961_v42 = vpop.f32.mrf.mxu3 }
 0x6a9   :  { %1995 = vsyncpa [#allocation4], 1 }
 0x6aa   :  { %1996 = vsyncpa [#allocation6], 1 }

</bundles_post_ra>
